<compile_context>
chip_gen: v5e
topology: v5e:2x2
jax: 0.10.0
libtpu: 0.0.40
codegen_flags: <defaults>
</compile_context>

<pallas_src>
import functools

import jax
import jax.numpy as jnp
from jax.experimental import pallas as pl
from jax.experimental.pallas import tpu as pltpu

# ----------------------------- configuration -------------------------------
BATCH = 2
IN_CH = 4
SPATIAL = 16
NUM_CLASS = 10
HIDDEN = 32
DIM = 128            # MoCo embedding dim (default dim=128)
K_QUEUE = 512        # queue length (small stand-in for K=8192); K % batch == 0
MOMENTUM = 0.999
TEMP = 0.07          # T is unused in the reference forward; kept for completeness
MROWS = 8            # sublane-padded row count for tiny-M matmuls / stores
HEAD_N = 256         # proj(128) + cls(10), padded to a multiple of 128 lanes
QUEUE_DTYPE = jnp.bfloat16   # queue stored bf16 (reference fp32; ~1e-2 rel diff)
EPS = 1e-12          # F.normalize eps

PARAM_NAMES = ("conv_w", "conv_b", "head_w", "head_b")


# ----------------------------- fused encoder kernel --------------------------
def _encoder_kernel(patch_ref, cw_ref, cb_ref, pool_ref, hw_ref, hb_ref, out_ref):
    """One encoder forward entirely in VMEM:
       conv-matmul(+bias,+relu) -> GAP (as matmul) -> fused [proj|cls] head -> L2 norm.
       All matmuls use bf16 operands on the MXU with f32 accumulation."""
    h = jnp.dot(patch_ref[...], cw_ref[...].astype(jnp.bfloat16),
                preferred_element_type=jnp.float32)
    h = jnp.maximum(h + cb_ref[...], 0.0)                        # (NHW, HIDDEN)
    # global average pool as a tiny matmul with a block-averaging matrix
    pooled = jnp.dot(pool_ref[...], h.astype(jnp.bfloat16),
                     preferred_element_type=jnp.float32)         # (MROWS, HIDDEN)
    # fused heads: one lane-aligned matmul producing [proj(128) | cls(10) | pad]
    y = jnp.dot(pooled.astype(jnp.bfloat16), hw_ref[...].astype(jnp.bfloat16),
                preferred_element_type=jnp.float32) + hb_ref[...]  # (MROWS, HEAD_N)
    proj = y[:, :DIM]
    # F.normalize: x / max(||x||, eps)  ==  x * rsqrt(max(||x||^2, eps^2))
    sq = jnp.sum(proj * proj, axis=-1, keepdims=True)
    emb = proj * jax.lax.rsqrt(jnp.maximum(sq, EPS * EPS))
    out_ref[...] = jnp.concatenate([emb, y[:, DIM:]], axis=-1)


def pallas_encoder_stack(patches, conv_w, conv_b, head_w, head_b, pool_mat):
    """Run E stacked encoders (leading axis) in a single pallas_call."""
    E, NHW, KC = patches.shape
    return pl.pallas_call(
        _encoder_kernel,
        out_shape=jax.ShapeDtypeStruct((E, MROWS, HEAD_N), jnp.float32),
        grid=(E,),
        in_specs=[
            pl.BlockSpec((None, NHW, KC), lambda e: (e, 0, 0)),
            pl.BlockSpec((None, KC, HIDDEN), lambda e: (e, 0, 0)),
            pl.BlockSpec((None, 1, HIDDEN), lambda e: (e, 0, 0)),
            pl.BlockSpec((MROWS, NHW), lambda e: (0, 0)),
            pl.BlockSpec((None, HIDDEN, HEAD_N), lambda e: (e, 0, 0)),
            pl.BlockSpec((None, 1, HEAD_N), lambda e: (e, 0, 0)),
        ],
        out_specs=pl.BlockSpec((None, MROWS, HEAD_N), lambda e: (e, 0, 0)),
        compiler_params=pltpu.CompilerParams(
            dimension_semantics=("parallel",)),
    )(patches, conv_w, conv_b, pool_mat, head_w, head_b)


# ----------------------------- momentum-update kernel ------------------------
def _momentum_kernel(cw, cb, hw, hb, cwo, cbo, hwo, hbo, *, m):
    """Each param is stacked [q, k] along axis 0:
       out[0] = q (unchanged), out[1] = m * k + (1 - m) * q."""
    for src, dst in ((cw, cwo), (cb, cbo), (hw, hwo), (hb, hbo)):
        pq = src[0]
        dst[0] = pq
        dst[1] = src[1] * m + pq * (1.0 - m)


def pallas_momentum_update(params, m):
    """param_k <- m * param_k + (1 - m) * param_q in ONE kernel, no repacking."""
    outs = pl.pallas_call(
        functools.partial(_momentum_kernel, m=m),
        out_shape=tuple(jax.ShapeDtypeStruct(params[n].shape, params[n].dtype)
                        for n in PARAM_NAMES),
        input_output_aliases={i: i for i in range(len(PARAM_NAMES))},
    )(*(params[n] for n in PARAM_NAMES))
    return dict(zip(PARAM_NAMES, outs))


# ----------------------------- queue match + fused enqueue -------------------
def _choose_tk(k):
    # >= 2 grid steps keeps both v7x TensorCores busy; single-TC v5e/v6e would
    # prefer tk == k (one step).  Blocks stay tiny vs v7x's 64 MiB VMEM.
    tk = max(128, k // 2)
    while k % tk:
        tk //= 2
    return tk


def _queue_match_kernel(ptr_ref, qlw_ref, qlc_ref, q_ref, kT_ref,
                        dq_ref, lq_ref,
                        res_ref, pred_ref, dqo_ref, lqo_ref, *, tk):
    j = pl.program_id(0)
    # queRes tile: bf16 operands into the MXU, f32 accumulation
    res_ref[...] = jnp.dot(q_ref[...], dq_ref[...],
                           preferred_element_type=jnp.float32)
    # predictlabel tile: +1 where queue label matches query label, else -1
    pred_ref[...] = jnp.where(lq_ref[...] == qlc_ref[...],
                              1.0, -1.0).astype(jnp.float32)
    # fused _dequeue_and_enqueue: reads above saw the OLD queue; now write the
    # tile back with k.T / q_label selected into global columns [ptr, ptr+BATCH)
    ptr = ptr_ref[0]
    kT = kT_ref[...]                                             # (DIM, MROWS)
    lane_dq = jax.lax.broadcasted_iota(jnp.int32, (DIM, tk), 1) + j * tk
    lane_lq = jax.lax.broadcasted_iota(jnp.int32, (1, tk), 1) + j * tk
    new_dq = dq_ref[...]
    new_lq = lq_ref[...]
    for b in range(BATCH):                                       # static, tiny
        new_dq = jnp.where(lane_dq == ptr + b, kT[:, b:b + 1], new_dq)
        new_lq = jnp.where(lane_lq == ptr + b, qlw_ref[b], new_lq)
    dqo_ref[...] = new_dq
    lqo_ref[...] = new_lq


def pallas_queue_match_enqueue(q_bf, kT, dataqueue, labelqueue, q_label, queue_ptr):
    """Fused einsum('nc,ck->nk') + label comparison + queue enqueue."""
    dim, K = dataqueue.shape
    assert K % 128 == 0
    tk = _choose_tk(K)
    lq2 = labelqueue.reshape(1, K).astype(jnp.int32)
    qlc = jnp.pad(q_label.reshape(BATCH, 1).astype(jnp.int32),
                  ((0, MROWS - BATCH), (0, 0)), constant_values=-1)
    ptr1 = jnp.asarray(queue_ptr, jnp.int32).reshape(1)
    ql_sm = q_label.astype(jnp.int32)
    res, pred, dq_new, lq_new = pl.pallas_call(
        functools.partial(_queue_match_kernel, tk=tk),
        out_shape=(
            jax.ShapeDtypeStruct((MROWS, K), jnp.float32),
            jax.ShapeDtypeStruct((MROWS, K), jnp.float32),
            jax.ShapeDtypeStruct((dim, K), dataqueue.dtype),
            jax.ShapeDtypeStruct((1, K), jnp.int32),
        ),
        grid=(K // tk,),
        in_specs=[
            pl.BlockSpec(memory_space=pltpu.MemorySpace.SMEM),   # queue_ptr (1,)
            pl.BlockSpec(memory_space=pltpu.MemorySpace.SMEM),   # q_label (BATCH,)
            pl.BlockSpec((MROWS, 1), lambda j: (0, 0)),          # q_label column
            pl.BlockSpec((MROWS, dim), lambda j: (0, 0)),        # q (bf16, padded)
            pl.BlockSpec((dim, MROWS), lambda j: (0, 0)),        # k.T (queue dtype)
            pl.BlockSpec((dim, tk), lambda j: (0, j)),           # dataqueue tile
            pl.BlockSpec((1, tk), lambda j: (0, j)),             # labelqueue tile
        ],
        out_specs=(
            pl.BlockSpec((MROWS, tk), lambda j: (0, j)),
            pl.BlockSpec((MROWS, tk), lambda j: (0, j)),
            pl.BlockSpec((dim, tk), lambda j: (0, j)),
            pl.BlockSpec((1, tk), lambda j: (0, j)),
        ),
        input_output_aliases={5: 2, 6: 3},                       # dq, lq in-place
        compiler_params=pltpu.CompilerParams(
            dimension_semantics=("parallel",)),
    )(ptr1, ql_sm, qlc, q_bf, kT, dataqueue, lq2)
    return res, pred, dq_new, lq_new.reshape(K)


# ----------------------------- encoder glue ----------------------------------
def _im2col_3x3(x_nhwc):
    """3x3, stride 1, pad 1 patch extraction: (N,H,W,C) -> (N*H*W, 9C)."""
    # TODO(synk): at realistic H,W,C move im2col inside the fused conv kernel
    # (9 shifted VMEM loads / pltpu.roll) instead of a 9x patch blow-up in HBM.
    N, H, W, C = x_nhwc.shape
    xp = jnp.pad(x_nhwc, ((0, 0), (1, 1), (1, 1), (0, 0)))
    cols = [xp[:, dy:dy + H, dx:dx + W, :] for dy in range(3) for dx in range(3)]
    return jnp.concatenate(cols, axis=-1).reshape(N * H * W, 9 * C)


def _pool_matrix(n, hw):
    """(MROWS, n*hw) block-averaging matrix; rows >= n are zero (row padding)."""
    eye = jnp.eye(MROWS, n, dtype=jnp.float32)
    return (jnp.repeat(eye, hw, axis=1) / float(hw)).astype(jnp.bfloat16)


def moco_encoders(params, images):
    """images: (E, N, C, H, W); params already stacked with leading axis E.
    Returns (E, MROWS, HEAD_N) = [L2-normalized emb(128) | cls(10) | pad]."""
    E = images.shape[0]
    x = jnp.transpose(images.reshape(E * BATCH, IN_CH, SPATIAL, SPATIAL),
                      (0, 2, 3, 1)).astype(jnp.float32)
    patches = _im2col_3x3(x).reshape(
        E, BATCH * SPATIAL * SPATIAL, 9 * IN_CH).astype(jnp.bfloat16)
    pool = _pool_matrix(BATCH, SPATIAL * SPATIAL)     # compile-time constant
    return pallas_encoder_stack(patches, params["conv_w"], params["conv_b"],
                                params["head_w"], params["head_b"], pool)


# ----------------------------- MoCo forward ----------------------------------
def moco_forward(params, state, im_q, im_k, q_label, is_train=True, m=MOMENTUM):
    if not is_train:
        params_q = {n: params[n][0:1] for n in PARAM_NAMES}
        enc = moco_encoders(params_q, im_q[None])
        return enc[0, :BATCH, DIM:DIM + NUM_CLASS]

    # 1) momentum update of key-encoder row (one Pallas kernel, aliased in place)
    params_new = pallas_momentum_update(params, m)

    # 2) both encoder forwards in ONE pallas_call (grid over encoders, "parallel")
    enc = moco_encoders(params_new, jnp.stack([im_q, im_k]))
    emb = enc[:, :, :DIM]                         # normalized; rows >= BATCH are 0
    cls_q = enc[0, :BATCH, DIM:DIM + NUM_CLASS]
    q = emb[0, :BATCH]
    k = emb[1, :BATCH]                            # key-encoder fwd only (no grad)

    # 3) queRes + predictlabel + fused ring-buffer enqueue, one pallas_call
    q_bf = emb[0].astype(jnp.bfloat16)            # (MROWS, DIM), already row-padded
    kT = jnp.transpose(emb[1]).astype(QUEUE_DTYPE)  # (DIM, MROWS)
    res, pred, dq_new, lq_new = pallas_queue_match_enqueue(
        q_bf, kT, state["dataqueue"], state["labelqueue"], q_label,
        state["queue_ptr"])

    new_state = {
        "dataqueue": dq_new,
        "labelqueue": lq_new,
        "queue_ptr": (state["queue_ptr"] + BATCH) % K_QUEUE,
    }
    return (cls_q, q, res[:BATCH], pred[:BATCH]), params_new, new_state


# ----------------------------- parameter / state init ------------------------
def init_moco_params(key):
    k1, k2, k3 = jax.random.split(key, 3)
    conv_w = 0.05 * jax.random.normal(k1, (9 * IN_CH, HIDDEN), jnp.float32)
    conv_b = jnp.zeros((1, HIDDEN), jnp.float32)
    cls_w = 0.05 * jax.random.normal(k2, (HIDDEN, NUM_CLASS), jnp.float32)
    proj_w = 0.05 * jax.random.normal(k3, (HIDDEN, DIM), jnp.float32)
    head_w = jnp.zeros((HIDDEN, HEAD_N), jnp.float32)
    head_w = head_w.at[:, :DIM].set(proj_w).at[:, DIM:DIM + NUM_CLASS].set(cls_w)
    head_b = jnp.zeros((1, HEAD_N), jnp.float32)
    per_enc = {"conv_w": conv_w, "conv_b": conv_b,
               "head_w": head_w, "head_b": head_b}
    # encoder_k starts as an exact copy of encoder_q (reference __init__).
    # Leading axis: [0]=encoder_q, [1]=encoder_k; this stacked slab layout is
    # used directly by both the momentum kernel and the fused encoder kernel.
    return {n: jnp.stack([v, v]) for n, v in per_enc.items()}


if __name__ == "__main__":
    root = jax.random.PRNGKey(0)
    k_enc, k_dq, k_iq, k_ik, k_lbl = jax.random.split(root, 5)

    params = init_moco_params(k_enc)
    state = {
        # torch: register_buffer('dataqueue', torch.rand(dim, K)); stored bf16
        "dataqueue": jax.random.uniform(
            k_dq, (DIM, K_QUEUE), jnp.float32).astype(QUEUE_DTYPE),
        "labelqueue": jnp.zeros((K_QUEUE,), jnp.int32),
        "queue_ptr": jnp.int32(0),
    }
    im_q = jax.random.normal(k_iq, (BATCH, IN_CH, SPATIAL, SPATIAL), jnp.float32)
    im_k = jax.random.normal(k_ik, (BATCH, IN_CH, SPATIAL, SPATIAL), jnp.float32)
    q_label = jax.random.randint(k_lbl, (BATCH,), 0, NUM_CLASS, jnp.int32)

    fwd = jax.jit(moco_forward, static_argnames=("is_train",))
    (cls_q, q, queRes, predictlabel), params_new, new_state = fwd(
        params, state, im_q, im_k, q_label, is_train=True)
    jax.block_until_ready((cls_q, q, queRes, predictlabel, params_new, new_state))

    # shapes
    assert cls_q.shape == (BATCH, NUM_CLASS)
    assert q.shape == (BATCH, DIM)
    assert queRes.shape == (BATCH, K_QUEUE)
    assert predictlabel.shape == (BATCH, K_QUEUE)
    assert predictlabel.dtype == jnp.float32
    assert new_state["dataqueue"].shape == (DIM, K_QUEUE)
    assert new_state["labelqueue"].shape == (K_QUEUE,)
    assert int(new_state["queue_ptr"]) == BATCH

    # queRes == einsum('nc,ck->nk', q, old dataqueue)   (bf16 tolerance)
    ref_res = jnp.einsum("nc,ck->nk", q, state["dataqueue"].astype(jnp.float32))
    assert jnp.allclose(queRes, ref_res, rtol=2e-2, atol=2e-2)

    # labelqueue starts at zero -> predictlabel row n is +1 iff q_label[n] == 0
    exp_pred = jnp.broadcast_to(
        jnp.where((q_label == 0)[:, None], 1.0, -1.0), (BATCH, K_QUEUE))
    assert jnp.array_equal(predictlabel, exp_pred)

    # fused enqueue: columns [0, BATCH) hold normalized keys, rest unchanged
    dq_new = new_state["dataqueue"].astype(jnp.float32)
    dq_old = state["dataqueue"].astype(jnp.float32)
    assert jnp.array_equal(dq_new[:, BATCH:], dq_old[:, BATCH:])
    assert jnp.all(jnp.abs(jnp.linalg.norm(dq_new[:, :BATCH], axis=0) - 1.0) < 0.05)
    assert jnp.array_equal(new_state["labelqueue"][:BATCH], q_label)
    assert jnp.array_equal(new_state["labelqueue"][BATCH:],
                           state["labelqueue"][BATCH:])

    # momentum update: q row untouched; zeroed k row -> (1 - m) * q row
    assert jnp.array_equal(params_new["conv_w"][0], params["conv_w"][0])
    zk = {n: params[n].at[1].set(0.0) for n in PARAM_NAMES}
    upd = jax.jit(lambda p: pallas_momentum_update(p, MOMENTUM))(zk)
    assert jnp.allclose(upd["conv_w"][1],
                        (1.0 - MOMENTUM) * params["conv_w"][0],
                        rtol=1e-6, atol=1e-6)

    # eval path (is_train=False) returns cls only, matching the train cls_q
    cls_eval = fwd(params, state, im_q, im_k, q_label, is_train=False)
    jax.block_until_ready(cls_eval)
    assert cls_eval.shape == (BATCH, NUM_CLASS)
    assert jnp.allclose(cls_eval, cls_q, rtol=1e-3, atol=1e-3)

    print("KERNEL_OK")
</pallas_src>

<mosaic_0001>
module attributes {stable_mosaic.version = 11 : i64} {
  func.func @_momentum_kernel(%arg0: memref<2x36x32xf32, #tpu.memory_space<vmem>>, %arg1: memref<2x1x32xf32, #tpu.memory_space<vmem>>, %arg2: memref<2x32x256xf32, #tpu.memory_space<vmem>>, %arg3: memref<2x1x256xf32, #tpu.memory_space<vmem>>, %arg4: memref<2x36x32xf32, #tpu.memory_space<vmem>>, %arg5: memref<2x1x32xf32, #tpu.memory_space<vmem>>, %arg6: memref<2x32x256xf32, #tpu.memory_space<vmem>>, %arg7: memref<2x1x256xf32, #tpu.memory_space<vmem>>) attributes {dimension_semantics = [], scalar_prefetch = 0 : i64, scratch_operands = 0 : i64, tpu.core_type = #tpu.core_type<tc>} {
    %c0 = arith.constant 0 : index
    %c0_0 = arith.constant 0 : index
    %c0_1 = arith.constant 0 : index
    %0 = vector.load %arg0[%c0, %c0_0, %c0_1] : memref<2x36x32xf32, #tpu.memory_space<vmem>>, vector<1x36x32xf32>
    %1 = vector.shape_cast %0 : vector<1x36x32xf32> to vector<36x32xf32>
    %c0_2 = arith.constant 0 : index
    %c0_3 = arith.constant 0 : index
    %c0_4 = arith.constant 0 : index
    %2 = vector.load %arg4[%c0_2, %c0_3, %c0_4] : memref<2x36x32xf32, #tpu.memory_space<vmem>>, vector<1x36x32xf32>
    %3 = vector.shape_cast %2 : vector<1x36x32xf32> to vector<36x32xf32>
    %4 = vector.shape_cast %1 : vector<36x32xf32> to vector<1x36x32xf32>
    tpu.vector_store %arg4[%c0_2, %c0_3, %c0_4], %4 {strides = array<i32>} : memref<2x36x32xf32, #tpu.memory_space<vmem>>, vector<1x36x32xf32>,
    %c1 = arith.constant 1 : index
    %c0_5 = arith.constant 0 : index
    %c0_6 = arith.constant 0 : index
    %5 = vector.load %arg0[%c1, %c0_5, %c0_6] : memref<2x36x32xf32, #tpu.memory_space<vmem>>, vector<1x36x32xf32>
    %6 = vector.shape_cast %5 : vector<1x36x32xf32> to vector<36x32xf32>
    %cst = arith.constant 9.990000e-01 : f32
    %7 = vector.broadcast %cst : f32 to vector<36x32xf32>
    %8 = arith.mulf %6, %7 : vector<36x32xf32>
    %cst_7 = arith.constant 1.000000e-03 : f32
    %9 = vector.broadcast %cst_7 : f32 to vector<36x32xf32>
    %10 = arith.mulf %1, %9 : vector<36x32xf32>
    %11 = arith.addf %8, %10 : vector<36x32xf32>
    %c1_8 = arith.constant 1 : index
    %c0_9 = arith.constant 0 : index
    %c0_10 = arith.constant 0 : index
    %12 = vector.load %arg4[%c1_8, %c0_9, %c0_10] : memref<2x36x32xf32, #tpu.memory_space<vmem>>, vector<1x36x32xf32>
    %13 = vector.shape_cast %12 : vector<1x36x32xf32> to vector<36x32xf32>
    %14 = vector.shape_cast %11 : vector<36x32xf32> to vector<1x36x32xf32>
    tpu.vector_store %arg4[%c1_8, %c0_9, %c0_10], %14 {strides = array<i32>} : memref<2x36x32xf32, #tpu.memory_space<vmem>>, vector<1x36x32xf32>,
    %c0_11 = arith.constant 0 : index
    %c0_12 = arith.constant 0 : index
    %c0_13 = arith.constant 0 : index
    %15 = vector.load %arg1[%c0_11, %c0_12, %c0_13] : memref<2x1x32xf32, #tpu.memory_space<vmem>>, vector<1x1x32xf32>
    %16 = vector.shape_cast %15 : vector<1x1x32xf32> to vector<1x32xf32>
    %c0_14 = arith.constant 0 : index
    %c0_15 = arith.constant 0 : index
    %c0_16 = arith.constant 0 : index
    %17 = vector.load %arg5[%c0_14, %c0_15, %c0_16] : memref<2x1x32xf32, #tpu.memory_space<vmem>>, vector<1x1x32xf32>
    %18 = vector.shape_cast %17 : vector<1x1x32xf32> to vector<1x32xf32>
    %19 = vector.shape_cast %16 : vector<1x32xf32> to vector<1x1x32xf32>
    tpu.vector_store %arg5[%c0_14, %c0_15, %c0_16], %19 {strides = array<i32>} : memref<2x1x32xf32, #tpu.memory_space<vmem>>, vector<1x1x32xf32>,
    %c1_17 = arith.constant 1 : index
    %c0_18 = arith.constant 0 : index
    %c0_19 = arith.constant 0 : index
    %20 = vector.load %arg1[%c1_17, %c0_18, %c0_19] : memref<2x1x32xf32, #tpu.memory_space<vmem>>, vector<1x1x32xf32>
    %21 = vector.shape_cast %20 : vector<1x1x32xf32> to vector<1x32xf32>
    %cst_20 = arith.constant 9.990000e-01 : f32
    %22 = vector.broadcast %cst_20 : f32 to vector<1x32xf32>
    %23 = arith.mulf %21, %22 : vector<1x32xf32>
    %cst_21 = arith.constant 1.000000e-03 : f32
    %24 = vector.broadcast %cst_21 : f32 to vector<1x32xf32>
    %25 = arith.mulf %16, %24 : vector<1x32xf32>
    %26 = arith.addf %23, %25 : vector<1x32xf32>
    %c1_22 = arith.constant 1 : index
    %c0_23 = arith.constant 0 : index
    %c0_24 = arith.constant 0 : index
    %27 = vector.load %arg5[%c1_22, %c0_23, %c0_24] : memref<2x1x32xf32, #tpu.memory_space<vmem>>, vector<1x1x32xf32>
    %28 = vector.shape_cast %27 : vector<1x1x32xf32> to vector<1x32xf32>
    %29 = vector.shape_cast %26 : vector<1x32xf32> to vector<1x1x32xf32>
    tpu.vector_store %arg5[%c1_22, %c0_23, %c0_24], %29 {strides = array<i32>} : memref<2x1x32xf32, #tpu.memory_space<vmem>>, vector<1x1x32xf32>,
    %c0_25 = arith.constant 0 : index
    %c0_26 = arith.constant 0 : index
    %c0_27 = arith.constant 0 : index
    %30 = vector.load %arg2[%c0_25, %c0_26, %c0_27] : memref<2x32x256xf32, #tpu.memory_space<vmem>>, vector<1x32x256xf32>
    %31 = vector.shape_cast %30 : vector<1x32x256xf32> to vector<32x256xf32>
    %c0_28 = arith.constant 0 : index
    %c0_29 = arith.constant 0 : index
    %c0_30 = arith.constant 0 : index
    %32 = vector.load %arg6[%c0_28, %c0_29, %c0_30] : memref<2x32x256xf32, #tpu.memory_space<vmem>>, vector<1x32x256xf32>
    %33 = vector.shape_cast %32 : vector<1x32x256xf32> to vector<32x256xf32>
    %34 = vector.shape_cast %31 : vector<32x256xf32> to vector<1x32x256xf32>
    tpu.vector_store %arg6[%c0_28, %c0_29, %c0_30], %34 {strides = array<i32>} : memref<2x32x256xf32, #tpu.memory_space<vmem>>, vector<1x32x256xf32>,
    %c1_31 = arith.constant 1 : index
    %c0_32 = arith.constant 0 : index
    %c0_33 = arith.constant 0 : index
    %35 = vector.load %arg2[%c1_31, %c0_32, %c0_33] : memref<2x32x256xf32, #tpu.memory_space<vmem>>, vector<1x32x256xf32>
    %36 = vector.shape_cast %35 : vector<1x32x256xf32> to vector<32x256xf32>
    %cst_34 = arith.constant 9.990000e-01 : f32
    %37 = vector.broadcast %cst_34 : f32 to vector<32x256xf32>
    %38 = arith.mulf %36, %37 : vector<32x256xf32>
    %cst_35 = arith.constant 1.000000e-03 : f32
    %39 = vector.broadcast %cst_35 : f32 to vector<32x256xf32>
    %40 = arith.mulf %31, %39 : vector<32x256xf32>
    %41 = arith.addf %38, %40 : vector<32x256xf32>
    %c1_36 = arith.constant 1 : index
    %c0_37 = arith.constant 0 : index
    %c0_38 = arith.constant 0 : index
    %42 = vector.load %arg6[%c1_36, %c0_37, %c0_38] : memref<2x32x256xf32, #tpu.memory_space<vmem>>, vector<1x32x256xf32>
    %43 = vector.shape_cast %42 : vector<1x32x256xf32> to vector<32x256xf32>
    %44 = vector.shape_cast %41 : vector<32x256xf32> to vector<1x32x256xf32>
    tpu.vector_store %arg6[%c1_36, %c0_37, %c0_38], %44 {strides = array<i32>} : memref<2x32x256xf32, #tpu.memory_space<vmem>>, vector<1x32x256xf32>,
    %c0_39 = arith.constant 0 : index
    %c0_40 = arith.constant 0 : index
    %c0_41 = arith.constant 0 : index
    %45 = vector.load %arg3[%c0_39, %c0_40, %c0_41] : memref<2x1x256xf32, #tpu.memory_space<vmem>>, vector<1x1x256xf32>
    %46 = vector.shape_cast %45 : vector<1x1x256xf32> to vector<1x256xf32>
    %c0_42 = arith.constant 0 : index
    %c0_43 = arith.constant 0 : index
    %c0_44 = arith.constant 0 : index
    %47 = vector.load %arg7[%c0_42, %c0_43, %c0_44] : memref<2x1x256xf32, #tpu.memory_space<vmem>>, vector<1x1x256xf32>
    %48 = vector.shape_cast %47 : vector<1x1x256xf32> to vector<1x256xf32>
    %49 = vector.shape_cast %46 : vector<1x256xf32> to vector<1x1x256xf32>
    tpu.vector_store %arg7[%c0_42, %c0_43, %c0_44], %49 {strides = array<i32>} : memref<2x1x256xf32, #tpu.memory_space<vmem>>, vector<1x1x256xf32>,
    %c1_45 = arith.constant 1 : index
    %c0_46 = arith.constant 0 : index
    %c0_47 = arith.constant 0 : index
    %50 = vector.load %arg3[%c1_45, %c0_46, %c0_47] : memref<2x1x256xf32, #tpu.memory_space<vmem>>, vector<1x1x256xf32>
    %51 = vector.shape_cast %50 : vector<1x1x256xf32> to vector<1x256xf32>
    %cst_48 = arith.constant 9.990000e-01 : f32
    %52 = vector.broadcast %cst_48 : f32 to vector<1x256xf32>
    %53 = arith.mulf %51, %52 : vector<1x256xf32>
    %cst_49 = arith.constant 1.000000e-03 : f32
    %54 = vector.broadcast %cst_49 : f32 to vector<1x256xf32>
    %55 = arith.mulf %46, %54 : vector<1x256xf32>
    %56 = arith.addf %53, %55 : vector<1x256xf32>
    %c1_50 = arith.constant 1 : index
    %c0_51 = arith.constant 0 : index
    %c0_52 = arith.constant 0 : index
    %57 = vector.load %arg7[%c1_50, %c0_51, %c0_52] : memref<2x1x256xf32, #tpu.memory_space<vmem>>, vector<1x1x256xf32>
    %58 = vector.shape_cast %57 : vector<1x1x256xf32> to vector<1x256xf32>
    %59 = vector.shape_cast %56 : vector<1x256xf32> to vector<1x1x256xf32>
    tpu.vector_store %arg7[%c1_50, %c0_51, %c0_52], %59 {strides = array<i32>} : memref<2x1x256xf32, #tpu.memory_space<vmem>>, vector<1x1x256xf32>,
    return
  }
}

module attributes {stable_mosaic.version = 11 : i64} {
  func.func @_encoder_kernel(%arg0: i32, %arg1: memref<1x512x36xbf16, #tpu.memory_space<vmem>>, %arg2: memref<1x36x32xf32, #tpu.memory_space<vmem>>, %arg3: memref<1x1x32xf32, #tpu.memory_space<vmem>>, %arg4: memref<8x512xbf16, #tpu.memory_space<vmem>>, %arg5: memref<1x32x256xf32, #tpu.memory_space<vmem>>, %arg6: memref<1x1x256xf32, #tpu.memory_space<vmem>>, %arg7: memref<1x8x256xf32, #tpu.memory_space<vmem>>) attributes {dimension_semantics = [#tpu.dimension_semantics<parallel>], iteration_bounds = array<i64: 2>, scalar_prefetch = 0 : i64, scratch_operands = 0 : i64, tpu.core_type = #tpu.core_type<tc>, window_params = [{transform_indices = @transform_0, window_bounds = array<i64: 1, 512, 36>}, {transform_indices = @transform_1, window_bounds = array<i64: 1, 36, 32>}, {transform_indices = @transform_2, window_bounds = array<i64: 1, 1, 32>}, {pipeline_mode = #tpu.pipeline_mode<synchronous>, transform_indices = @transform_3, window_bounds = array<i64: 8, 512>}, {transform_indices = @transform_4, window_bounds = array<i64: 1, 32, 256>}, {transform_indices = @transform_5, window_bounds = array<i64: 1, 1, 256>}, {transform_indices = @transform_6, window_bounds = array<i64: 1, 8, 256>}]} {
    %c0 = arith.constant 0 : index
    %c0_0 = arith.constant 0 : index
    %c0_1 = arith.constant 0 : index
    %0 = vector.load %arg1[%c0, %c0_0, %c0_1] : memref<1x512x36xbf16, #tpu.memory_space<vmem>>, vector<1x512x36xbf16>
    %1 = vector.shape_cast %0 : vector<1x512x36xbf16> to vector<512x36xbf16>
    %c0_2 = arith.constant 0 : index
    %c0_3 = arith.constant 0 : index
    %c0_4 = arith.constant 0 : index
    %2 = vector.load %arg2[%c0_2, %c0_3, %c0_4] : memref<1x36x32xf32, #tpu.memory_space<vmem>>, vector<1x36x32xf32>
    %3 = vector.shape_cast %2 : vector<1x36x32xf32> to vector<36x32xf32>
    %4 = arith.truncf %3 : vector<36x32xf32> to vector<36x32xbf16>
    %cst = arith.constant dense<0.000000e+00> : vector<512x32xf32>
    %5 = tpu.matmul %1, %4, %cst {dimension_numbers = #tpu.dot_dimension_numbers<[1], [0], [0], [1], [0, 0, 1, 1], [], []>} : vector<512x36xbf16>, vector<36x32xbf16>, vector<512x32xf32> -> vector<512x32xf32>
    %c0_5 = arith.constant 0 : index
    %c0_6 = arith.constant 0 : index
    %c0_7 = arith.constant 0 : index
    %6 = vector.load %arg3[%c0_5, %c0_6, %c0_7] : memref<1x1x32xf32, #tpu.memory_space<vmem>>, vector<1x1x32xf32>
    %7 = vector.shape_cast %6 : vector<1x1x32xf32> to vector<1x32xf32>
    %8 = vector.broadcast %7 : vector<1x32xf32> to vector<512x32xf32>
    %9 = arith.addf %5, %8 : vector<512x32xf32>
    %cst_8 = arith.constant 0.000000e+00 : f32
    %10 = vector.broadcast %cst_8 : f32 to vector<512x32xf32>
    %11 = arith.maximumf %9, %10 : vector<512x32xf32>
    %c0_9 = arith.constant 0 : index
    %c0_10 = arith.constant 0 : index
    %12 = vector.load %arg4[%c0_9, %c0_10] : memref<8x512xbf16, #tpu.memory_space<vmem>>, vector<8x512xbf16>
    %13 = arith.truncf %11 : vector<512x32xf32> to vector<512x32xbf16>
    %cst_11 = arith.constant dense<0.000000e+00> : vector<8x32xf32>
    %14 = tpu.matmul %12, %13, %cst_11 {dimension_numbers = #tpu.dot_dimension_numbers<[1], [0], [0], [1], [0, 0, 1, 1], [], []>} : vector<8x512xbf16>, vector<512x32xbf16>, vector<8x32xf32> -> vector<8x32xf32>
    %15 = arith.truncf %14 : vector<8x32xf32> to vector<8x32xbf16>
    %c0_12 = arith.constant 0 : index
    %c0_13 = arith.constant 0 : index
    %c0_14 = arith.constant 0 : index
    %16 = vector.load %arg5[%c0_12, %c0_13, %c0_14] : memref<1x32x256xf32, #tpu.memory_space<vmem>>, vector<1x32x256xf32>
    %17 = vector.shape_cast %16 : vector<1x32x256xf32> to vector<32x256xf32>
    %18 = arith.truncf %17 : vector<32x256xf32> to vector<32x256xbf16>
    %cst_15 = arith.constant dense<0.000000e+00> : vector<8x256xf32>
    %19 = tpu.matmul %15, %18, %cst_15 {dimension_numbers = #tpu.dot_dimension_numbers<[1], [0], [0], [1], [0, 0, 1, 1], [], []>} : vector<8x32xbf16>, vector<32x256xbf16>, vector<8x256xf32> -> vector<8x256xf32>
    %c0_16 = arith.constant 0 : index
    %c0_17 = arith.constant 0 : index
    %c0_18 = arith.constant 0 : index
    %20 = vector.load %arg6[%c0_16, %c0_17, %c0_18] : memref<1x1x256xf32, #tpu.memory_space<vmem>>, vector<1x1x256xf32>
    %21 = vector.shape_cast %20 : vector<1x1x256xf32> to vector<1x256xf32>
    %22 = vector.broadcast %21 : vector<1x256xf32> to vector<8x256xf32>
    %23 = arith.addf %19, %22 : vector<8x256xf32>
    %24 = vector.extract_strided_slice %23 {offsets = [0, 0], sizes = [8, 128], strides = [1, 1]} : vector<8x256xf32> to vector<8x128xf32>
    %25 = arith.mulf %24, %24 : vector<8x128xf32>
    %cst_19 = arith.constant dense<0.000000e+00> : vector<8xf32>
    %26 = vector.multi_reduction <add>, %25, %cst_19 [1] : vector<8x128xf32> to vector<8xf32>
    %27 = vector.shape_cast %26 : vector<8xf32> to vector<8x1xf32>
    %cst_20 = arith.constant 1.000000e-24 : f32
    %28 = vector.broadcast %cst_20 : f32 to vector<8x1xf32>
    %29 = arith.maximumf %27, %28 : vector<8x1xf32>
    %30 = math.rsqrt %29 : vector<8x1xf32>
    %31 = vector.broadcast %30 : vector<8x1xf32> to vector<8x128xf32>
    %32 = arith.mulf %24, %31 : vector<8x128xf32>
    %33 = vector.extract_strided_slice %23 {offsets = [0, 128], sizes = [8, 128], strides = [1, 1]} : vector<8x256xf32> to vector<8x128xf32>
    %34 = tpu.concatenate %32, %33 in 1 : vector<8x128xf32>, vector<8x128xf32> -> vector<8x256xf32>
    %c0_21 = arith.constant 0 : index
    %c0_22 = arith.constant 0 : index
    %c0_23 = arith.constant 0 : index
    %35 = vector.load %arg7[%c0_21, %c0_22, %c0_23] : memref<1x8x256xf32, #tpu.memory_space<vmem>>, vector<1x8x256xf32>
    %36 = vector.shape_cast %35 : vector<1x8x256xf32> to vector<8x256xf32>
    %37 = vector.shape_cast %34 : vector<8x256xf32> to vector<1x8x256xf32>
    tpu.vector_store %arg7[%c0_21, %c0_22, %c0_23], %37 {strides = array<i32>} : memref<1x8x256xf32, #tpu.memory_space<vmem>>, vector<1x8x256xf32>,
    return
  }
  func.func @transform_0(%arg0: i32) -> (i32, i32, i32) {
    %c0_i32 = arith.constant 0 : i32
    %c0_i32_0 = arith.constant 0 : i32
    %c0_i32_1 = arith.constant 0 : i32
    return %arg0, %c0_i32, %c0_i32_0 : i32, i32, i32
  }
  func.func @transform_1(%arg0: i32) -> (i32, i32, i32) {
    %c0_i32 = arith.constant 0 : i32
    %c0_i32_0 = arith.constant 0 : i32
    %c0_i32_1 = arith.constant 0 : i32
    return %arg0, %c0_i32, %c0_i32_0 : i32, i32, i32
  }
  func.func @transform_2(%arg0: i32) -> (i32, i32, i32) {
    %c0_i32 = arith.constant 0 : i32
    %c0_i32_0 = arith.constant 0 : i32
    %c0_i32_1 = arith.constant 0 : i32
    return %arg0, %c0_i32, %c0_i32_0 : i32, i32, i32
  }
  func.func @transform_3(%arg0: i32) -> (i32, i32) {
    %c0_i32 = arith.constant 0 : i32
    %c0_i32_0 = arith.constant 0 : i32
    %c0_i32_1 = arith.constant 0 : i32
    return %c0_i32, %c0_i32_0 : i32, i32
  }
  func.func @transform_4(%arg0: i32) -> (i32, i32, i32) {
    %c0_i32 = arith.constant 0 : i32
    %c0_i32_0 = arith.constant 0 : i32
    %c0_i32_1 = arith.constant 0 : i32
    return %arg0, %c0_i32, %c0_i32_0 : i32, i32, i32
  }
  func.func @transform_5(%arg0: i32) -> (i32, i32, i32) {
    %c0_i32 = arith.constant 0 : i32
    %c0_i32_0 = arith.constant 0 : i32
    %c0_i32_1 = arith.constant 0 : i32
    return %arg0, %c0_i32, %c0_i32_0 : i32, i32, i32
  }
  func.func @transform_6(%arg0: i32) -> (i32, i32, i32) {
    %c0_i32 = arith.constant 0 : i32
    %c0_i32_0 = arith.constant 0 : i32
    %c0_i32_1 = arith.constant 0 : i32
    return %arg0, %c0_i32, %c0_i32_0 : i32, i32, i32
  }
}

module attributes {stable_mosaic.version = 11 : i64} {
  func.func @_queue_match_kernel(%arg0: i32, %arg1: memref<1xi32, #tpu.memory_space<smem>>, %arg2: memref<2xi32, #tpu.memory_space<smem>>, %arg3: memref<8x1xi32, #tpu.memory_space<vmem>>, %arg4: memref<8x128xbf16, #tpu.memory_space<vmem>>, %arg5: memref<128x8xbf16, #tpu.memory_space<vmem>>, %arg6: memref<128x256xbf16, #tpu.memory_space<vmem>>, %arg7: memref<1x256xi32, #tpu.memory_space<vmem>>, %arg8: memref<8x256xf32, #tpu.memory_space<vmem>>, %arg9: memref<8x256xf32, #tpu.memory_space<vmem>>, %arg10: memref<128x256xbf16, #tpu.memory_space<vmem>>, %arg11: memref<1x256xi32, #tpu.memory_space<vmem>>) attributes {dimension_semantics = [#tpu.dimension_semantics<parallel>], iteration_bounds = array<i64: 2>, scalar_prefetch = 0 : i64, scratch_operands = 0 : i64, tpu.core_type = #tpu.core_type<tc>, window_params = [{transform_indices = @transform_0, window_bounds = array<i64: 1>}, {transform_indices = @transform_1, window_bounds = array<i64: 2>}, {pipeline_mode = #tpu.pipeline_mode<synchronous>, transform_indices = @transform_2, window_bounds = array<i64: 8, 1>}, {pipeline_mode = #tpu.pipeline_mode<synchronous>, transform_indices = @transform_3, window_bounds = array<i64: 8, 128>}, {pipeline_mode = #tpu.pipeline_mode<synchronous>, transform_indices = @transform_4, window_bounds = array<i64: 128, 8>}, {transform_indices = @transform_5, window_bounds = array<i64: 128, 256>}, {transform_indices = @transform_6, window_bounds = array<i64: 1, 256>}, {transform_indices = @transform_7, window_bounds = array<i64: 8, 256>}, {transform_indices = @transform_8, window_bounds = array<i64: 8, 256>}, {transform_indices = @transform_9, window_bounds = array<i64: 128, 256>}, {transform_indices = @transform_10, window_bounds = array<i64: 1, 256>}]} {
    %c0 = arith.constant 0 : index
    %c0_0 = arith.constant 0 : index
    %0 = vector.load %arg4[%c0, %c0_0] : memref<8x128xbf16, #tpu.memory_space<vmem>>, vector<8x128xbf16>
    %c0_1 = arith.constant 0 : index
    %c0_2 = arith.constant 0 : index
    %1 = vector.load %arg6[%c0_1, %c0_2] : memref<128x256xbf16, #tpu.memory_space<vmem>>, vector<128x256xbf16>
    %cst = arith.constant dense<0.000000e+00> : vector<8x256xf32>
    %2 = tpu.matmul %0, %1, %cst {dimension_numbers = #tpu.dot_dimension_numbers<[1], [0], [0], [1], [0, 0, 1, 1], [], []>} : vector<8x128xbf16>, vector<128x256xbf16>, vector<8x256xf32> -> vector<8x256xf32>
    %c0_3 = arith.constant 0 : index
    %c0_4 = arith.constant 0 : index
    %3 = vector.load %arg8[%c0_3, %c0_4] : memref<8x256xf32, #tpu.memory_space<vmem>>, vector<8x256xf32>
    tpu.vector_store %arg8[%c0_3, %c0_4], %2 {strides = array<i32>} : memref<8x256xf32, #tpu.memory_space<vmem>>, vector<8x256xf32>,
    %c0_5 = arith.constant 0 : index
    %c0_6 = arith.constant 0 : index
    %4 = vector.load %arg7[%c0_5, %c0_6] : memref<1x256xi32, #tpu.memory_space<vmem>>, vector<1x256xi32>
    %c0_7 = arith.constant 0 : index
    %c0_8 = arith.constant 0 : index
    %5 = vector.load %arg3[%c0_7, %c0_8] : memref<8x1xi32, #tpu.memory_space<vmem>>, vector<8x1xi32>
    %6 = vector.broadcast %4 : vector<1x256xi32> to vector<8x256xi32>
    %7 = vector.broadcast %5 : vector<8x1xi32> to vector<8x256xi32>
    %8 = arith.cmpi eq, %6, %7 : vector<8x256xi32>
    %cst_9 = arith.constant 1.000000e+00 : f32
    %cst_10 = arith.constant -1.000000e+00 : f32
    %9 = vector.broadcast %cst_9 : f32 to vector<8x256xf32>
    %10 = vector.broadcast %cst_10 : f32 to vector<8x256xf32>
    %11 = arith.select %8, %9, %10 : vector<8x256xi1>, vector<8x256xf32>
    %c0_11 = arith.constant 0 : index
    %c0_12 = arith.constant 0 : index
    %12 = vector.load %arg9[%c0_11, %c0_12] : memref<8x256xf32, #tpu.memory_space<vmem>>, vector<8x256xf32>
    tpu.vector_store %arg9[%c0_11, %c0_12], %11 {strides = array<i32>} : memref<8x256xf32, #tpu.memory_space<vmem>>, vector<8x256xf32>,
    %c0_13 = arith.constant 0 : index
    %13 = memref.load %arg1[%c0_13] : memref<1xi32, #tpu.memory_space<smem>>
    %c0_14 = arith.constant 0 : index
    %c0_15 = arith.constant 0 : index
    %14 = vector.load %arg5[%c0_14, %c0_15] : memref<128x8xbf16, #tpu.memory_space<vmem>>, vector<128x8xbf16>
    %15 = tpu.iota {dimensions = array<i32: 1>} : vector<128x256xi32>
    %c256_i32 = arith.constant 256 : i32
    %16 = arith.muli %arg0, %c256_i32 : i32
    %17 = vector.broadcast %16 : i32 to vector<128x256xi32>
    %18 = arith.addi %15, %17 : vector<128x256xi32>
    %19 = tpu.iota {dimensions = array<i32: 1>} : vector<1x256xi32>
    %c256_i32_16 = arith.constant 256 : i32
    %20 = arith.muli %arg0, %c256_i32_16 : i32
    %21 = vector.broadcast %20 : i32 to vector<1x256xi32>
    %22 = arith.addi %19, %21 : vector<1x256xi32>
    %c0_17 = arith.constant 0 : index
    %c0_18 = arith.constant 0 : index
    %23 = vector.load %arg6[%c0_17, %c0_18] : memref<128x256xbf16, #tpu.memory_space<vmem>>, vector<128x256xbf16>
    %c0_19 = arith.constant 0 : index
    %c0_20 = arith.constant 0 : index
    %24 = vector.load %arg7[%c0_19, %c0_20] : memref<1x256xi32, #tpu.memory_space<vmem>>, vector<1x256xi32>
    %c0_i32 = arith.constant 0 : i32
    %25 = arith.addi %13, %c0_i32 : i32
    %26 = vector.broadcast %25 : i32 to vector<128x256xi32>
    %27 = arith.cmpi eq, %18, %26 : vector<128x256xi32>
    %28 = vector.extract_strided_slice %14 {offsets = [0, 0], sizes = [128, 1], strides = [1, 1]} : vector<128x8xbf16> to vector<128x1xbf16>
    %29 = vector.shape_cast %28 : vector<128x1xbf16> to vector<128x1xbf16>
    %30 = vector.broadcast %29 : vector<128x1xbf16> to vector<128x256xbf16>
    %31 = arith.select %27, %30, %23 : vector<128x256xi1>, vector<128x256xbf16>
    %c0_i32_21 = arith.constant 0 : i32
    %32 = arith.addi %13, %c0_i32_21 : i32
    %33 = vector.broadcast %32 : i32 to vector<1x256xi32>
    %34 = arith.cmpi eq, %22, %33 : vector<1x256xi32>
    %c0_22 = arith.constant 0 : index
    %35 = memref.load %arg2[%c0_22] : memref<2xi32, #tpu.memory_space<smem>>
    %36 = vector.broadcast %35 : i32 to vector<1x256xi32>
    %37 = arith.select %34, %36, %24 : vector<1x256xi1>, vector<1x256xi32>
    %c1_i32 = arith.constant 1 : i32
    %38 = arith.addi %13, %c1_i32 : i32
    %39 = vector.broadcast %38 : i32 to vector<128x256xi32>
    %40 = arith.cmpi eq, %18, %39 : vector<128x256xi32>
    %41 = vector.extract_strided_slice %14 {offsets = [0, 1], sizes = [128, 1], strides = [1, 1]} : vector<128x8xbf16> to vector<128x1xbf16>
    %42 = vector.shape_cast %41 : vector<128x1xbf16> to vector<128x1xbf16>
    %43 = vector.broadcast %42 : vector<128x1xbf16> to vector<128x256xbf16>
    %44 = arith.select %40, %43, %31 : vector<128x256xi1>, vector<128x256xbf16>
    %c1_i32_23 = arith.constant 1 : i32
    %45 = arith.addi %13, %c1_i32_23 : i32
    %46 = vector.broadcast %45 : i32 to vector<1x256xi32>
    %47 = arith.cmpi eq, %22, %46 : vector<1x256xi32>
    %c1 = arith.constant 1 : index
    %48 = memref.load %arg2[%c1] : memref<2xi32, #tpu.memory_space<smem>>
    %49 = vector.broadcast %48 : i32 to vector<1x256xi32>
    %50 = arith.select %47, %49, %37 : vector<1x256xi1>, vector<1x256xi32>
    %c0_24 = arith.constant 0 : index
    %c0_25 = arith.constant 0 : index
    %51 = vector.load %arg10[%c0_24, %c0_25] : memref<128x256xbf16, #tpu.memory_space<vmem>>, vector<128x256xbf16>
    tpu.vector_store %arg10[%c0_24, %c0_25], %44 {strides = array<i32>} : memref<128x256xbf16, #tpu.memory_space<vmem>>, vector<128x256xbf16>,
    %c0_26 = arith.constant 0 : index
    %c0_27 = arith.constant 0 : index
    %52 = vector.load %arg11[%c0_26, %c0_27] : memref<1x256xi32, #tpu.memory_space<vmem>>, vector<1x256xi32>
    tpu.vector_store %arg11[%c0_26, %c0_27], %50 {strides = array<i32>} : memref<1x256xi32, #tpu.memory_space<vmem>>, vector<1x256xi32>,
    return
  }
  func.func @transform_0(%arg0: i32) -> i32 {
    %c0_i32 = arith.constant 0 : i32
    %c0_i32_0 = arith.constant 0 : i32
    return %c0_i32 : i32
  }
  func.func @transform_1(%arg0: i32) -> i32 {
    %c0_i32 = arith.constant 0 : i32
    %c0_i32_0 = arith.constant 0 : i32
    return %c0_i32 : i32
  }
  func.func @transform_2(%arg0: i32) -> (i32, i32) {
    %c0_i32 = arith.constant 0 : i32
    %c0_i32_0 = arith.constant 0 : i32
    %c0_i32_1 = arith.constant 0 : i32
    return %c0_i32, %c0_i32_0 : i32, i32
  }
  func.func @transform_3(%arg0: i32) -> (i32, i32) {
    %c0_i32 = arith.constant 0 : i32
    %c0_i32_0 = arith.constant 0 : i32
    %c0_i32_1 = arith.constant 0 : i32
    return %c0_i32, %c0_i32_0 : i32, i32
  }
  func.func @transform_4(%arg0: i32) -> (i32, i32) {
    %c0_i32 = arith.constant 0 : i32
    %c0_i32_0 = arith.constant 0 : i32
    %c0_i32_1 = arith.constant 0 : i32
    return %c0_i32, %c0_i32_0 : i32, i32
  }
  func.func @transform_5(%arg0: i32) -> (i32, i32) {
    %c0_i32 = arith.constant 0 : i32
    %c0_i32_0 = arith.constant 0 : i32
    return %c0_i32, %arg0 : i32, i32
  }
  func.func @transform_6(%arg0: i32) -> (i32, i32) {
    %c0_i32 = arith.constant 0 : i32
    %c0_i32_0 = arith.constant 0 : i32
    return %c0_i32, %arg0 : i32, i32
  }
  func.func @transform_7(%arg0: i32) -> (i32, i32) {
    %c0_i32 = arith.constant 0 : i32
    %c0_i32_0 = arith.constant 0 : i32
    return %c0_i32, %arg0 : i32, i32
  }
  func.func @transform_8(%arg0: i32) -> (i32, i32) {
    %c0_i32 = arith.constant 0 : i32
    %c0_i32_0 = arith.constant 0 : i32
    return %c0_i32, %arg0 : i32, i32
  }
  func.func @transform_9(%arg0: i32) -> (i32, i32) {
    %c0_i32 = arith.constant 0 : i32
    %c0_i32_0 = arith.constant 0 : i32
    return %c0_i32, %arg0 : i32, i32
  }
  func.func @transform_10(%arg0: i32) -> (i32, i32) {
    %c0_i32 = arith.constant 0 : i32
    %c0_i32_0 = arith.constant 0 : i32
    return %c0_i32, %arg0 : i32, i32
  }
}

</mosaic_0001>

<bundles_post_ra>
// kernel: moco_forward.3
= control target key start
LH: loop header
LB: loop body
LE: loop exit
PB: predicated region body
PF: predicated region fallthrough
CT: control target
= control target key end

     0   :  { %vm26_vm0 = vcmask 261120   ;;  %vm31_vm1 = vcmask 257024   ;;  %vm61_vm2 = vcmask 253952   ;;  %s417_s0 = inlined_call_operand.vmem [shape: f32[2,36,32], index: 0, kind: input, shape index: {}, may-alias: {0,4}]   ;;  %s418_s4 = inlined_call_operand.vmem [shape: f32[2,36,32], index: 4, kind: output, shape index: {0}, may-alias: {0,4}]   ;;  %s419_s2 = inlined_call_operand.vmem [shape: f32[2,32,256], index: 2, kind: input, shape index: {}, may-alias: {2,6}]   ;;  %s420_s1 = inlined_call_operand.vmem [shape: f32[2,1,32], index: 1, kind: input, shape index: {}, may-alias: {1,5}]   ;;  %s421_s6 = inlined_call_operand.vmem [shape: f32[2,32,256], index: 6, kind: output, shape index: {2}, may-alias: {2,6}]   ;;  %s422_s5 = inlined_call_operand.vmem [shape: f32[2,1,32], index: 5, kind: output, shape index: {1}, may-alias: {1,5}]   ;;  %s423_s3 = inlined_call_operand.vmem [shape: f32[2,1,256], index: 3, kind: input, shape index: {}, may-alias: {3,7}]   ;;  %s424_s7 = inlined_call_operand.vmem [shape: f32[2,1,256], index: 7, kind: output, shape index: {3}, may-alias: {3,7}]  }
   0x1   :  { %v21_v0 = vld [vmem:[%s417_s0] sm:$0xff]  ;;  %v22_v1 = vld [vmem:[%s417_s0 + $0x8] sm:$0xff]  ;;  %v23_v2 = vld [vmem:[%s417_s0 + $0x10] sm:$0xff] }
   0x2   :  { %27 = vst.msk [vmem:[%s418_s4] sm:$0xff] %vm26_vm0, %v21_v0  ;;  %v44_v3 = vmul.f32 0.001, %v21_v0  ;;  %v45_v4 = vmul.f32 0.001, %v22_v1  ;;  %v70_v18 = vld [vmem:[%s419_s2] sm:$0xff] }
   0x3   :  { %v46_v6 = vmul.f32 0.001, %v23_v2  ;;  %v60_v22 = vld [vmem:[%s420_s1] sm:$0x1]  ;;  %78 = vst [vmem:[%s421_s6] sm:$0xff] %v70_v18  ;;  %v167_v28 = vld [vmem:[%s420_s1 + $0x1] sm:$0x1] }
   0x4   :  { %v66_v25 = vmul.f32 0.001, %v60_v22  ;;  %v65_v31 = vmul.f32 0.999, %v167_v28  ;;  %v103_v33 = vmul.f32 0.001, %v70_v18 }
   0x5   :  { %62 = vst.msk [vmem:[%s422_s5] sm:$0x1] %vm61_vm2, %v60_v22  ;;  %v128_v63 = vld [vmem:[%s423_s3] sm:$0x3]  ;;  %v185_v0 = vld [vmem:[%s423_s3 + $0x2] sm:$0x3] }
   0x6   :  { %v67_v36 = vadd.f32 %v66_v25, %v65_v31 }
   0x8   :  { %168 = vst.msk [vmem:[%s422_s5 + $0x1] sm:$0x1] %vm61_vm2, %v67_v36 }
   0x9   :  { %v24_v5 = vld [vmem:[%s417_s0 + $0x18] sm:$0xff] }
   0xa   :  { %28 = vst.msk [vmem:[%s418_s4 + $0x8] sm:$0xff] %vm26_vm0, %v22_v1  ;;  %v47_v7 = vmul.f32 0.001, %v24_v5  ;;  %v71_v26 = vld [vmem:[%s419_s2 + $0x8] sm:$0xff]  ;;  %v72_v29 = vld [vmem:[%s419_s2 + $0x10] sm:$0xff]  ;;  %v73_v32 = vld [vmem:[%s419_s2 + $0x18] sm:$0xff] }
   0xb   :  { %v104_v34 = vmul.f32 0.001, %v71_v26  ;;  %v74_v35 = vld [vmem:[%s419_s2 + $0x20] sm:$0xff]  ;;  %v105_v37 = vmul.f32 0.001, %v72_v29  ;;  %v75_v38 = vld [vmem:[%s419_s2 + $0x28] sm:$0xff] }
   0xc   :  { %v76_v39 = vld [vmem:[%s419_s2 + $0x30] sm:$0xff]  ;;  %v106_v40 = vmul.f32 0.001, %v73_v32  ;;  %v107_v41 = vmul.f32 0.001, %v74_v35  ;;  %v169_v43 = vld [vmem:[%s419_s2 + $0x40] sm:$0xff] }
   0xd   :  { %v108_v42 = vmul.f32 0.001, %v75_v38  ;;  %v170_v44 = vld [vmem:[%s419_s2 + $0x48] sm:$0xff]  ;;  %v109_v45 = vmul.f32 0.001, %v76_v39 }
   0xe   :  { %79 = vst [vmem:[%s421_s6 + $0x8] sm:$0xff] %v71_v26  ;;  %v95_v46 = vmul.f32 0.999, %v169_v43  ;;  %v96_v48 = vmul.f32 0.999, %v170_v44 }
  0x10   :  { %v111_v56 = vadd.f32 %v103_v33, %v95_v46  ;;  %v112_v59 = vadd.f32 %v104_v34, %v96_v48 }
  0x11   :  { %v157_v8 = vld [vmem:[%s417_s0 + $0x28] sm:$0xff] }
  0x12   :  { %29 = vst.msk [vmem:[%s418_s4 + $0x10] sm:$0xff] %vm26_vm0, %v23_v2  ;;  %v39_v10 = vmul.f32 0.999, %v157_v8  ;;  %v136_v8 = vmul.f32 0.999, %v185_v0 }
  0x14   :  { %v49_v15 = vadd.f32 %v44_v3, %v39_v10 }
  0x15   :  { %v171_v47 = vld [vmem:[%s419_s2 + $0x50] sm:$0xff] }
  0x16   :  { %80 = vst [vmem:[%s421_s6 + $0x10] sm:$0xff] %v72_v29  ;;  %v97_v49 = vmul.f32 0.999, %v171_v47 }
  0x18   :  { %v113_v62 = vadd.f32 %v105_v37, %v97_v49 }
  0x19   :  { %v25_v9 = vld [vmem:[%s417_s0 + $0x20] sm:$0xf]  ;;  %v158_v11 = vld [vmem:[%s417_s0 + $0x30] sm:$0xff] }
  0x1a   :  { %30 = vst.msk [vmem:[%s418_s4 + $0x18] sm:$0xff] %vm26_vm0, %v24_v5  ;;  %v48_v12 = vmul.f32 0.001, %v25_v9  ;;  %v40_v13 = vmul.f32 0.999, %v158_v11 }
  0x1c   :  { %v50_v19 = vadd.f32 %v45_v4, %v40_v13 }
  0x1d   :  { %v172_v50 = vld [vmem:[%s419_s2 + $0x58] sm:$0xff] }
  0x1e   :  { %81 = vst [vmem:[%s421_s6 + $0x18] sm:$0xff] %v73_v32  ;;  %v98_v51 = vmul.f32 0.999, %v172_v50 }
  0x20   :  { %v114_v2 = vadd.f32 %v106_v40, %v98_v51 }
  0x21   :  { %v159_v14 = vld [vmem:[%s417_s0 + $0x38] sm:$0xff] }
  0x22   :  { %32 = vst.msk [vmem:[%s418_s4 + $0x20] sm:$0xf] %vm31_vm1, %v25_v9  ;;  %v41_v16 = vmul.f32 0.999, %v159_v14 }
  0x24   :  { %v51_v23 = vadd.f32 %v46_v6, %v41_v16  ;;  %v129_v6 = vlaneseq }
  0x25   :  { %v173_v52 = vld [vmem:[%s419_s2 + $0x60] sm:$0xff]  ;;  %v174_v53 = vld [vmem:[%s419_s2 + $0x68] sm:$0xff]  ;;  %v175_v54 = vld [vmem:[%s419_s2 + $0x70] sm:$0xff] }
  0x26   :  { %82 = vst [vmem:[%s421_s6 + $0x20] sm:$0xff] %v74_v35  ;;  %v99_v57 = vmul.f32 0.999, %v173_v52  ;;  %v100_v60 = vmul.f32 0.999, %v174_v53  ;;  %vm131_vm3 = vcmp.lt.s32.totalorder %v129_v6, 256 }
  0x27   :  { %v101_v61 = vmul.f32 0.999, %v175_v54  ;;  %133 = vst.msk [vmem:[%s424_s7] sm:$0x3] %vm131_vm3, %v128_v63 }
  0x28   :  { %v115_v4 = vadd.f32 %v107_v41, %v99_v57  ;;  %v116_v5 = vadd.f32 %v108_v42, %v100_v60 }
  0x29   :  { %v160_v17 = vld [vmem:[%s417_s0 + $0x40] sm:$0xff]  ;;  %v161_v21 = vld [vmem:[%s417_s0 + $0x48] sm:$0xf]  ;;  %v117_v9 = vadd.f32 %v109_v45, %v101_v61 }
  0x2a   :  { %v42_v20 = vmul.f32 0.999, %v160_v17  ;;  %162 = vst.msk [vmem:[%s418_s4 + $0x28] sm:$0xff] %vm26_vm0, %v49_v15  ;;  %v43_v24 = vmul.f32 0.999, %v161_v21 }
  0x2b   :  { %163 = vst.msk [vmem:[%s418_s4 + $0x30] sm:$0xff] %vm26_vm0, %v50_v19 }
  0x2c   :  { %v52_v27 = vadd.f32 %v47_v7, %v42_v20  ;;  %164 = vst.msk [vmem:[%s418_s4 + $0x38] sm:$0xff] %vm26_vm0, %v51_v23  ;;  %v53_v30 = vadd.f32 %v48_v12, %v43_v24  ;;  %v137_v7 = vmul.f32 0.001, %v128_v63 }
  0x2d   :  { %v77_v55 = vld [vmem:[%s419_s2 + $0x38] sm:$0xff] }
  0x2e   :  { %165 = vst.msk [vmem:[%s418_s4 + $0x40] sm:$0xff] %vm26_vm0, %v52_v27  ;;  %v176_v58 = vld [vmem:[%s419_s2 + $0x78] sm:$0xff]  ;;  %v110_v1 = vmul.f32 0.001, %v77_v55  ;;  %v138_v11 = vadd.f32 %v137_v7, %v136_v8 }
  0x2f   :  { %166 = vst.msk [vmem:[%s418_s4 + $0x48] sm:$0xf] %vm31_vm1, %v53_v30  ;;  %v102_v3 = vmul.f32 0.999, %v176_v58 }
  0x30   :  { %83 = vst [vmem:[%s421_s6 + $0x28] sm:$0xff] %v75_v38 }
  0x31   :  { %84 = vst [vmem:[%s421_s6 + $0x30] sm:$0xff] %v76_v39  ;;  %v118_v10 = vadd.f32 %v110_v1, %v102_v3 }
  0x32   :  { %85 = vst [vmem:[%s421_s6 + $0x38] sm:$0xff] %v77_v55 }
  0x33   :  { %177 = vst [vmem:[%s421_s6 + $0x40] sm:$0xff] %v111_v56 }
  0x34   :  { %178 = vst [vmem:[%s421_s6 + $0x48] sm:$0xff] %v112_v59 }
  0x35   :  { %179 = vst [vmem:[%s421_s6 + $0x50] sm:$0xff] %v113_v62 }
  0x36   :  { %180 = vst [vmem:[%s421_s6 + $0x58] sm:$0xff] %v114_v2 }
  0x37   :  { %181 = vst [vmem:[%s421_s6 + $0x60] sm:$0xff] %v115_v4 }
  0x38   :  { %182 = vst [vmem:[%s421_s6 + $0x68] sm:$0xff] %v116_v5 }
  0x39   :  { %183 = vst [vmem:[%s421_s6 + $0x70] sm:$0xff] %v117_v9 }
  0x3a   :  { %184 = vst [vmem:[%s421_s6 + $0x78] sm:$0xff] %v118_v10 }
  0x3b   :  { %186 = vst.msk [vmem:[%s424_s7 + $0x2] sm:$0x3] %vm131_vm3, %v138_v11 }

// kernel: moco_forward.4
= control target key start
LH: loop header
LB: loop body
LE: loop exit
PB: predicated region body
PF: predicated region fallthrough
CT: control target
= control target key end

     0   :  { %s1436_s21 = smov 0   ;;  %s1689_s0 = inlined_call_operand.vmem [shape: bf16[2,512,36], index: 0, kind: input, shape index: {}]   ;;  %s1690_s1 = inlined_call_operand.vmem [shape: f32[2,36,32], index: 1, kind: input, shape index: {}]   ;;  %s1691_s2 = inlined_call_operand.vmem [shape: f32[2,1,32], index: 2, kind: input, shape index: {}]   ;;  %s1692_s3 = inlined_call_operand.vmem [shape: bf16[8,512], index: 3, kind: input, shape index: {}]   ;;  %s1693_s4 = inlined_call_operand.vmem [shape: f32[2,32,256], index: 4, kind: input, shape index: {}]   ;;  %s1694_s5 = inlined_call_operand.vmem [shape: f32[2,1,256], index: 5, kind: input, shape index: {}]   ;;  %s1695_s6 = inlined_call_operand.vmem [shape: f32[2,8,256], index: 6, kind: output, shape index: {}]  }
   0x1 LB: > { %s1160_s22 = sadd.s32 4294967295, %s1399_s21   ;;  %p1164_p0 = scmp.ge.s32.totalorder %s1399_s21, 1  ;;  %s1399_s21 = sphi %s1436_s21, %s16_s21  }
   0x2   : > { %p249_p1 = scmp.lt.s32.totalorder %s1399_s21, 3 }
   0x4   : > { %p250_p2 = pnand %p1164_p0, %p249_p1 }
   0x5   : > { %p296_p3 = scmp.lt.s32.totalorder (!%p250_p2), %s1160_s22, 1 }
   0x6   : > { %253 = sbr.rel (%p250_p2) target bundleno = 756 (0x2f4), region = 44 }
   0xb   : > { %s1697_s22 = smov (!%p296_p3, %s1160_s22), 1  ;;  %vm657_vm0 = vcmask 1041408   ;;  %vm560_vm1 = vcmask 293888   ;;  %vm1013_vm2 = vcmask 261120  }
   0xc   : > { %s1381_s23 = smul.u32 40, %s1697_s22  ;;  %s308_s26 = scalar_lea.vmem %s1691_s2, %s1697_s22 }
   0xd   : > { %s1337_s30 = sshll.u32 %s1697_s22, 8  ;;  %v1525_v41 = vld [vmem:[%s308_s26] ss:$0 sm:$0xff]  ;;  %s1338_s16 = sshll.u32 %s1697_s22, 6 }
   0xe   : > { %s305_s29 = scalar_lea.vmem %s1690_s1, %s1381_s23  ;;  %s1458_s9 = scalar_lea.vmem %s1689_s0, %s1337_s30 }
   0xf   : > { %v392_v0 = vld [vmem:[%s305_s29 + $0x20] sm:$0xf]  ;;  %v390_v2 = vld [vmem:[%s305_s29 + $0x10] sm:$0xff]  ;;  %v391_v3 = vld [vmem:[%s305_s29 + $0x18] sm:$0xff]  ;;  %s313_s19 = scalar_lea.vmem %s1693_s4, %s1338_s16  ;;  %s1170_s20 = sshll.u32 %s1697_s22, 1 }
  0x10   : > { %v395_v1 = vpack.c.bf16 %v392_v0, %v392_v0  ;;  %v394_v5 = vpack.c.bf16 %v391_v3, %v390_v2  ;;  %v388_v6 = vld [vmem:[%s305_s29] sm:$0xff]  ;;  %v389_v7 = vld [vmem:[%s305_s29 + $0x8] sm:$0xff]  ;;  %v1355_v10 = vld [vmem:[%s1458_s9 + $0x78] sm:$0xff]  ;;  %s317_s25 = scalar_lea.vmem %s1694_s5, %s1170_s20  ;;  %s1339_s26 = sshll.u32 %s1697_s22, 4 }
  0x11   : > { %v393_v8 = vpack.c.bf16 %v389_v7, %v388_v6  ;;  %v1340_v9 = vld [vmem:[%s1458_s9] sm:$0xff]  ;;  %v1351_v11 = vld [vmem:[%s1458_s9 + $0x58] sm:$0xff]  ;;  %v1341_v13 = vld [vmem:[%s1458_s9 + $0x8] sm:$0xff]  ;;  %s322_s29 = scalar_lea.vmem %s1695_s6, %s1339_s26 }
  0x12   : > { %v659_v4 = vsel %vm657_vm0, %v395_v1, 0  ;;  %v1364_v12 = vld [vmem:[%s1458_s9 + $0xc0] sm:$0xff]  ;;  %v1365_v16 = vld [vmem:[%s1458_s9 + $0xc8] sm:$0xff]  ;;  %v1342_v17 = vld [vmem:[%s1458_s9 + $0x10] sm:$0xff] }
  0x13   : > { %666 = vmatpush.bf16.msra.mxu0 %v659_v4  ;;  %1373 = vmatpush.bf16.msra.mxu2 %v659_v4  ;;  %v1356_v14 = vld [vmem:[%s1458_s9 + $0x80] sm:$0xff]  ;;  %v1357_v18 = vld [vmem:[%s1458_s9 + $0x88] sm:$0xff]  ;;  %v1366_v20 = vld [vmem:[%s1458_s9 + $0xd0] sm:$0xff] }
  0x14   : > { %1372 = vmatpush.bf16.msra.mxu1 %v659_v4  ;;  %1374 = vmatpush.bf16.msra.mxu3 %v659_v4  ;;  %v1352_v15 = vld [vmem:[%s1458_s9 + $0x60] sm:$0xff]  ;;  %v1353_v19 = vld [vmem:[%s1458_s9 + $0x68] sm:$0xff]  ;;  %v1343_v21 = vld [vmem:[%s1458_s9 + $0x18] sm:$0xff] }
  0x15   : > { %v1358_v22 = vld [vmem:[%s1458_s9 + $0x90] sm:$0xff]  ;;  %v1367_v24 = vld [vmem:[%s1458_s9 + $0xd8] sm:$0xff]  ;;  %v1344_v25 = vld [vmem:[%s1458_s9 + $0x20] sm:$0xff] }
  0x16   : > { %v1354_v23 = vld [vmem:[%s1458_s9 + $0x70] sm:$0xff]  ;;  %v1359_v26 = vld [vmem:[%s1458_s9 + $0x98] sm:$0xff]  ;;  %v1368_v27 = vld [vmem:[%s1458_s9 + $0xe0] sm:$0xff] }
  0x17   : > { %667 = vmatpush.bf16.msra.mxu0 %v394_v5  ;;  %1376 = vmatpush.bf16.msra.mxu2 %v394_v5  ;;  %v1345_v28 = vld [vmem:[%s1458_s9 + $0x28] sm:$0xff]  ;;  %v1360_v29 = vld [vmem:[%s1458_s9 + $0xa0] sm:$0xff]  ;;  %v1346_v31 = vld [vmem:[%s1458_s9 + $0x30] sm:$0xff] }
  0x18   : > { %1375 = vmatpush.bf16.msra.mxu1 %v394_v5  ;;  %1377 = vmatpush.bf16.msra.mxu3 %v394_v5  ;;  %v1369_v30 = vld [vmem:[%s1458_s9 + $0xe8] sm:$0xff]  ;;  %v1370_v33 = vld [vmem:[%s1458_s9 + $0xf0] sm:$0xff]  ;;  %v1347_v34 = vld [vmem:[%s1458_s9 + $0x38] sm:$0xff] }
  0x19   : > { %v1361_v32 = vld [vmem:[%s1458_s9 + $0xa8] sm:$0xff]  ;;  %v1362_v35 = vld [vmem:[%s1458_s9 + $0xb0] sm:$0xff]  ;;  %v1371_v36 = vld [vmem:[%s1458_s9 + $0xf8] sm:$0xff] }
  0x1a   : > { %v1348_v37 = vld [vmem:[%s1458_s9 + $0x40] sm:$0xff]  ;;  %v1363_v38 = vld [vmem:[%s1458_s9 + $0xb8] sm:$0xff]  ;;  %v1349_v56 = vld [vmem:[%s1458_s9 + $0x48] sm:$0xff] }
  0x1b   : > { %668 = vmatpush.bf16.msra.mxu0 %v393_v8  ;;  %1379 = vmatpush.bf16.msra.mxu2 %v393_v8 }
  0x1c   : > { %1378 = vmatpush.bf16.msra.mxu1 %v393_v8  ;;  %1380 = vmatpush.bf16.msra.mxu3 %v393_v8 }
  0x1e   : > { %1301 = vmatmul.msk.bf16.vlgmr.msra.gmra.mxu0 %vm560_vm1, %v1340_v9  ;;  %1316 = vmatmul.msk.bf16.vlgmr.msra.gmra.mxu2 %vm560_vm1, %v1355_v10 }
  0x1f   : > { %1312 = vmatmul.msk.bf16.vlgmr.msra.gmra.mxu1 %vm560_vm1, %v1351_v11  ;;  %1325 = vmatmul.msk.bf16.vlgmr.msra.gmra.mxu3 %vm560_vm1, %v1364_v12 }
  0x2e   : > { %1302 = vmatmul.msk.bf16.gmra.mxu0 %vm560_vm1, %v1341_v13  ;;  %1317 = vmatmul.msk.bf16.gmra.mxu2 %vm560_vm1, %v1356_v14 }
  0x2f   : > { %1313 = vmatmul.msk.bf16.gmra.mxu1 %vm560_vm1, %v1352_v15  ;;  %1326 = vmatmul.msk.bf16.gmra.mxu3 %vm560_vm1, %v1365_v16  ;;  %v1350_v16 = vld [vmem:[%s1458_s9 + $0x50] sm:$0xff] }
  0x3e   : > { %1303 = vmatmul.msk.bf16.gmra.mxu0 %vm560_vm1, %v1342_v17  ;;  %1318 = vmatmul.msk.bf16.gmra.mxu2 %vm560_vm1, %v1357_v18 }
  0x3f   : > { %1314 = vmatmul.msk.bf16.gmra.mxu1 %vm560_vm1, %v1353_v19  ;;  %1327 = vmatmul.msk.bf16.gmra.mxu3 %vm560_vm1, %v1366_v20 }
  0x4e   : > { %1304 = vmatmul.msk.bf16.gmra.mxu0 %vm560_vm1, %v1343_v21  ;;  %1319 = vmatmul.msk.bf16.gmra.mxu2 %vm560_vm1, %v1358_v22 }
  0x4f   : > { %1315 = vmatmul.msk.bf16.gmra.mxu1 %vm560_vm1, %v1354_v23  ;;  %1328 = vmatmul.msk.bf16.gmra.mxu3 %vm560_vm1, %v1367_v24 }
  0x5e   : > { %1305 = vmatmul.msk.bf16.gmra.mxu0 %vm560_vm1, %v1344_v25  ;;  %1320 = vmatmul.msk.bf16.gmra.mxu2 %vm560_vm1, %v1359_v26 }
  0x5f   : > { %1329 = vmatmul.msk.bf16.gmra.mxu3 %vm560_vm1, %v1368_v27 }
  0x6e   : > { %1306 = vmatmul.msk.bf16.gmra.mxu0 %vm560_vm1, %v1345_v28  ;;  %1321 = vmatmul.msk.bf16.gmra.mxu2 %vm560_vm1, %v1360_v29 }
  0x6f   : > { %1330 = vmatmul.msk.bf16.gmra.mxu3 %vm560_vm1, %v1369_v30 }
  0x7e   : > { %1307 = vmatmul.msk.bf16.gmra.mxu0 %vm560_vm1, %v1346_v31  ;;  %1322 = vmatmul.msk.bf16.gmra.mxu2 %vm560_vm1, %v1361_v32 }
  0x7f   : > { %1331 = vmatmul.msk.bf16.gmra.mxu3 %vm560_vm1, %v1370_v33 }
  0x8e   : > { %1308 = vmatmul.msk.bf16.gmra.mxu0 %vm560_vm1, %v1347_v34  ;;  %1323 = vmatmul.msk.bf16.gmra.mxu2 %vm560_vm1, %v1362_v35 }
  0x8f   : > { %1332 = vmatmul.msk.bf16.gmra.mxu3 %vm560_vm1, %v1371_v36 }
  0x9b   : > { %v670_v39 = vpop.f32.mrf.mxu0 }
  0x9c   : > { %v1518_v40 = vpop.f32.mrf.mxu1  ;;  %v671_v43 = vadd.f32 %v1525_v41, %v670_v39 }
  0x9e   : > { %1309 = vmatmul.msk.bf16.gmra.mxu0 %vm560_vm1, %v1348_v37  ;;  %1324 = vmatmul.msk.bf16.gmra.mxu2 %vm560_vm1, %v1363_v38  ;;  %v830_v48 = vmax.f32 %v671_v43, 0.0 }
  0xa1   : > { %v745_v42 = vpop.f32.mrf.mxu2 }
  0xa2   : > { %v790_v44 = vpop.f32.mrf.mxu3  ;;  %v746_v49 = vadd.f32 %v1525_v41, %v745_v42 }
  0xa3   : > { %v672_v45 = vpop.f32.mrf.mxu0  ;;  %v791_v51 = vadd.f32 %v1525_v41, %v790_v44 }
  0xa4   : > { %v673_v46 = vadd.f32 %v1525_v41, %v672_v45  ;;  %v1531_v47 = vpop.f32.mrf.mxu1  ;;  %v860_v54 = vmax.f32 %v746_v49, 0.0 }
  0xa5   : > { %v878_v59 = vmax.f32 %v791_v51, 0.0 }
  0xa6   : > { %v831_v50 = vmax.f32 %v673_v46, 0.0 }
  0xa8   : > { %v1535_v52 = vpack.c.bf16 %v831_v50, %v830_v48 }
  0xa9   : > { %v747_v53 = vpop.f32.mrf.mxu2 }
  0xaa   : > { %v748_v55 = vadd.f32 %v1525_v41, %v747_v53  ;;  %v792_v57 = vpop.f32.mrf.mxu3 }
  0xab   : > { %v675_v58 = vpop.f32.mrf.mxu0  ;;  %v793_v60 = vadd.f32 %v1525_v41, %v792_v57 }
  0xac   : > { %v861_v61 = vmax.f32 %v748_v55, 0.0  ;;  %v1540_v62 = vpop.f32.mrf.mxu1  ;;  %v676_v3 = vadd.f32 %v1525_v41, %v675_v58 }
  0xad   : > { %v879_v63 = vmax.f32 %v793_v60, 0.0 }
  0xae   : > { %1310 = vmatmul.msk.bf16.gmra.mxu0 %vm560_vm1, %v1349_v56  ;;  %v911_v0 = vpack.c.bf16 %v861_v61, %v860_v54  ;;  %v832_v8 = vmax.f32 %v676_v3, 0.0 }
  0xaf   : > { %v1543_v1 = vpack.c.bf16 %v879_v63, %v878_v59  ;;  %v731_v63 = vadd.f32 %v1525_v41, %v1540_v62 }
  0xb0   : > { %955 = vmatpush.bf16.msrb.mxu2 %v911_v0 }
  0xb1   : > { %v750_v2 = vpop.f32.mrf.mxu2 }
  0xb2   : > { %v795_v4 = vpop.f32.mrf.mxu3  ;;  %v751_v9 = vadd.f32 %v1525_v41, %v750_v2 }
  0xb3   : > { %v677_v5 = vpop.f32.mrf.mxu0  ;;  %v796_v11 = vadd.f32 %v1525_v41, %v795_v4 }
  0xb4   : > { %v678_v6 = vadd.f32 %v1525_v41, %v677_v5  ;;  %v732_v7 = vpop.f32.mrf.mxu1  ;;  %v862_v14 = vmax.f32 %v751_v9, 0.0 }
  0xb5   : > { %v880_v19 = vmax.f32 %v796_v11, 0.0  ;;  %v733_v3 = vadd.f32 %v1525_v41, %v732_v7  ;;  %v854_v7 = vmax.f32 %v731_v63, 0.0 }
  0xb6   : > { %v833_v10 = vmax.f32 %v678_v6, 0.0 }
  0xb8   : > { %v1549_v12 = vpack.c.bf16 %v833_v10, %v832_v8 }
  0xb9   : > { %v752_v13 = vpop.f32.mrf.mxu2 }
  0xba   : > { %v753_v15 = vadd.f32 %v1525_v41, %v752_v13  ;;  %v797_v17 = vpop.f32.mrf.mxu3 }
  0xbb   : > { %v680_v18 = vpop.f32.mrf.mxu0  ;;  %v798_v20 = vadd.f32 %v1525_v41, %v797_v17 }
  0xbc   : > { %v863_v21 = vmax.f32 %v753_v15, 0.0  ;;  %v735_v22 = vpop.f32.mrf.mxu1  ;;  %v681_v27 = vadd.f32 %v1525_v41, %v680_v18 }
  0xbd   : > { %v881_v23 = vmax.f32 %v798_v20, 0.0  ;;  %v736_v57 = vadd.f32 %v1525_v41, %v735_v22  ;;  %v855_v20 = vmax.f32 %v733_v3, 0.0 }
  0xbe   : > { %1311 = vmatmul.msk.bf16.gmra.mxu0 %vm560_vm1, %v1350_v16  ;;  %v1555_v24 = vpack.c.bf16 %v863_v21, %v862_v14  ;;  %v834_v32 = vmax.f32 %v681_v27, 0.0  ;;  %v726_v14 = vadd.f32 %v1525_v41, %v1518_v40  ;;  %v728_v16 = vadd.f32 %v1525_v41, %v1531_v47 }
  0xbf   : > { %v1557_v25 = vpack.c.bf16 %v881_v23, %v880_v19  ;;  %v856_v8 = vmax.f32 %v736_v57, 0.0  ;;  %v908_v47 = vpack.c.bf16 %v855_v20, %v854_v7 }
  0xc1   : > { %v755_v26 = vpop.f32.mrf.mxu2 }
  0xc2   : > { %v800_v28 = vpop.f32.mrf.mxu3  ;;  %v756_v33 = vadd.f32 %v1525_v41, %v755_v26 }
  0xc3   : > { %v682_v29 = vpop.f32.mrf.mxu0  ;;  %v801_v35 = vadd.f32 %v1525_v41, %v800_v28 }
  0xc4   : > { %v683_v30 = vadd.f32 %v1525_v41, %v682_v29  ;;  %v737_v31 = vpop.f32.mrf.mxu1  ;;  %v864_v38 = vmax.f32 %v756_v33, 0.0  ;;  %v852_v29 = vmax.f32 %v726_v14, 0.0 }
  0xc5   : > { %v882_v44 = vmax.f32 %v801_v35, 0.0  ;;  %v738_v59 = vadd.f32 %v1525_v41, %v737_v31 }
  0xc6   : > { %v835_v34 = vmax.f32 %v683_v30, 0.0  ;;  %v853_v30 = vmax.f32 %v728_v16, 0.0 }
  0xc7   : > { %v857_v9 = vmax.f32 %v738_v59, 0.0 }
  0xc8   : > { %v1563_v36 = vpack.c.bf16 %v835_v34, %v834_v32  ;;  %v907_v35 = vpack.c.bf16 %v853_v30, %v852_v29 }
  0xc9   : > { %v757_v37 = vpop.f32.mrf.mxu2  ;;  %v909_v26 = vpack.c.bf16 %v857_v9, %v856_v8 }
  0xca   : > { %v758_v39 = vadd.f32 %v1525_v41, %v757_v37  ;;  %v802_v42 = vpop.f32.mrf.mxu3 }
  0xcb   : > { %v685_v43 = vpop.f32.mrf.mxu0  ;;  %v803_v45 = vadd.f32 %v1525_v41, %v802_v42 }
  0xcc   : > { %v865_v46 = vmax.f32 %v758_v39, 0.0  ;;  %v740_v48 = vpop.f32.mrf.mxu1  ;;  %v686_v55 = vadd.f32 %v1525_v41, %v685_v43 }
  0xcd   : > { %v883_v49 = vmax.f32 %v803_v45, 0.0  ;;  %v741_v54 = vadd.f32 %v1525_v41, %v740_v48 }
  0xce   : > { %v1567_v50 = vpack.c.bf16 %v865_v46, %v864_v38  ;;  %v836_v4 = vmax.f32 %v686_v55, 0.0 }
  0xcf   : > { %v1569_v51 = vpack.c.bf16 %v883_v49, %v882_v44  ;;  %v858_v0 = vmax.f32 %v741_v54, 0.0 }
  0xd1   : > { %v760_v53 = vpop.f32.mrf.mxu2 }
  0xd2   : > { %v805_v56 = vpop.f32.mrf.mxu3  ;;  %v761_v5 = vadd.f32 %v1525_v41, %v760_v53 }
  0xd3   : > { %v687_v58 = vpop.f32.mrf.mxu0  ;;  %v806_v11 = vadd.f32 %v1525_v41, %v805_v56 }
  0xd4   : > { %v688_v60 = vadd.f32 %v1525_v41, %v687_v58  ;;  %v742_v61 = vpop.f32.mrf.mxu1  ;;  %v866_v17 = vmax.f32 %v761_v5, 0.0 }
  0xd5   : > { %v743_v2 = vadd.f32 %v1525_v41, %v742_v61  ;;  %v884_v22 = vmax.f32 %v806_v11, 0.0 }
  0xd6   : > { %v837_v6 = vmax.f32 %v688_v60, 0.0 }
  0xd7   : > { %v859_v10 = vmax.f32 %v743_v2, 0.0 }
  0xd8   : > { %v1582_v13 = vpack.c.bf16 %v837_v6, %v836_v4 }
  0xd9   : > { %v762_v62 = vpop.f32.mrf.mxu2  ;;  %v910_v15 = vpack.c.bf16 %v859_v10, %v858_v0 }
  0xda   : > { %v763_v18 = vadd.f32 %v1525_v41, %v762_v62  ;;  %v807_v19 = vpop.f32.mrf.mxu3 }
  0xdb   : > { %v690_v21 = vpop.f32.mrf.mxu0  ;;  %956 = vmatpush.bf16.msrb.mxu2 %v910_v15  ;;  %v808_v23 = vadd.f32 %v1525_v41, %v807_v19 }
  0xdc   : > { %v867_v27 = vmax.f32 %v763_v18, 0.0  ;;  %v691_v20 = vadd.f32 %v1525_v41, %v690_v21 }
  0xdd   : > { %v885_v28 = vmax.f32 %v808_v23, 0.0 }
  0xde   : > { %v1590_v40 = vpack.c.bf16 %v867_v27, %v866_v17  ;;  %v838_v29 = vmax.f32 %v691_v20, 0.0 }
  0xdf   : > { %v1592_v31 = vpack.c.bf16 %v885_v28, %v884_v22  ;;  %957 = vmatpush.bf16.msrb.mxu2 %v909_v26 }
  0xe1   : > { %v765_v32 = vpop.f32.mrf.mxu2 }
  0xe2   : > { %v1594_v33 = vpop.f32.mrf.mxu3  ;;  %v766_v37 = vadd.f32 %v1525_v41, %v765_v32 }
  0xe3   : > { %v692_v34 = vpop.f32.mrf.mxu0  ;;  %958 = vmatpush.bf16.msrb.mxu2 %v908_v47 }
  0xe4   : > { %v868_v39 = vmax.f32 %v766_v37, 0.0  ;;  %v693_v17 = vadd.f32 %v1525_v41, %v692_v34 }
  0xe6   : > { %v839_v26 = vmax.f32 %v693_v17, 0.0 }
  0xe7   : > { %959 = vmatpush.bf16.msrb.mxu2 %v907_v35 }
  0xe8   : > { %v900_v47 = vpack.c.bf16 %v839_v26, %v838_v29 }
  0xe9   : > { %v767_v38 = vpop.f32.mrf.mxu2 }
  0xea   : > { %v768_v42 = vadd.f32 %v1525_v41, %v767_v38  ;;  %v1598_v45 = vpop.f32.mrf.mxu3 }
  0xeb   : > { %v695_v43 = vpop.f32.mrf.mxu0 }
  0xec   : > { %v869_v44 = vmax.f32 %v768_v42, 0.0  ;;  %v696_v15 = vadd.f32 %v1525_v41, %v695_v43 }
  0xee   : > { %v1600_v46 = vpack.c.bf16 %v869_v44, %v868_v39  ;;  %v840_v22 = vmax.f32 %v696_v15, 0.0 }
  0xf1   : > { %v1602_v48 = vpop.f32.mrf.mxu2 }
  0xf2   : > { %v1604_v53 = vpop.f32.mrf.mxu3 }
  0xf3   : > { %v697_v49 = vpop.f32.mrf.mxu0 }
  0xf4   : > { %v698_v10 = vadd.f32 %v1525_v41, %v697_v49 }
  0xf6   : > { %v841_v18 = vmax.f32 %v698_v10, 0.0 }
  0xf8   : > { %v901_v27 = vpack.c.bf16 %v841_v18, %v840_v22 }
  0xf9   : > { %v1606_v54 = vpop.f32.mrf.mxu2 }
  0xfa   : > { %v1608_v56 = vpop.f32.mrf.mxu3 }
  0xfb   : > { %v700_v55 = vpop.f32.mrf.mxu0 }
  0xfc   : > { %v701_v6 = vadd.f32 %v1525_v41, %v700_v55 }
  0xfe   : > { %v842_v16 = vmax.f32 %v701_v6, 0.0 }
 0x101   : > { %v775_v57 = vpop.f32.mrf.mxu2 }
 0x102   : > { %v820_v60 = vpop.f32.mrf.mxu3  ;;  %v776_v55 = vadd.f32 %v1525_v41, %v775_v57 }
 0x103   : > { %v702_v58 = vpop.f32.mrf.mxu0  ;;  %v821_v57 = vadd.f32 %v1525_v41, %v820_v60 }
 0x104   : > { %v703_v3 = vadd.f32 %v1525_v41, %v702_v58 }
 0x105   : > { %v890_v60 = vmax.f32 %v821_v57, 0.0 }
 0x106   : > { %v843_v11 = vmax.f32 %v703_v3, 0.0 }
 0x108   : > { %v902_v19 = vpack.c.bf16 %v843_v11, %v842_v16 }
 0x109   : > { %v777_v59 = vpop.f32.mrf.mxu2 }
 0x10a   : > { %v822_v5 = vpop.f32.mrf.mxu3  ;;  %v778_v58 = vadd.f32 %v1525_v41, %v777_v59 }
 0x10b   : > { %v705_v61 = vpop.f32.mrf.mxu0  ;;  %v823_v59 = vadd.f32 %v1525_v41, %v822_v5 }
 0x10c   : > { %v706_v0 = vadd.f32 %v1525_v41, %v705_v61 }
 0x10d   : > { %v891_v5 = vmax.f32 %v823_v59, 0.0 }
 0x10e   : > { %v844_v8 = vmax.f32 %v706_v0, 0.0 }
 0x10f   : > { %v926_v20 = vpack.c.bf16 %v891_v5, %v890_v60  ;;  %v1007_v60 = vld [vmem:[%s317_s25] sm:$0x3] }
 0x110   : > { %v1009_v5 = vperm.slane %v1007_v60, 0 }
 0x111   : > { %v780_v63 = vpop.f32.mrf.mxu2 }
 0x112   : > { %v825_v23 = vpop.f32.mrf.mxu3  ;;  %v781_v37 = vadd.f32 %v1525_v41, %v780_v63 }
 0x113   : > { %v707_v2 = vpop.f32.mrf.mxu0  ;;  %v826_v42 = vadd.f32 %v1525_v41, %v825_v23 }
 0x114   : > { %v708_v4 = vadd.f32 %v1525_v41, %v707_v2  ;;  %v874_v61 = vmax.f32 %v781_v37, 0.0  ;;  %v1635_v2 = vld [vmem:[%s1692_s3] sm:$0xff] }
 0x115   : > { %v930_v6 = vunpack.c.l.b16 %v1635_v2 }
 0x116   : > { %v845_v9 = vmax.f32 %v708_v4, 0.0  ;;  %v771_v4 = vadd.f32 %v1525_v41, %v1602_v48  ;;  %v818_v48 = vadd.f32 %v1525_v41, %v1608_v56 }
 0x117   : > { %v934_v15 = vpack.c.b16 %v930_v6, %v930_v6 }
 0x118   : > { %v903_v14 = vpack.c.bf16 %v845_v9, %v844_v8  ;;  %v872_v8 = vmax.f32 %v776_v55, 0.0  ;;  %v873_v9 = vmax.f32 %v778_v58, 0.0  ;;  %v870_v16 = vmax.f32 %v771_v4, 0.0  ;;  %v1001_v55 = vld [vmem:[%s313_s19 + $0x30] sm:$0xff]  ;;  %v1000_v58 = vld [vmem:[%s313_s19 + $0x28] sm:$0xff] }
 0x119   : > { %v782_v62 = vpop.f32.mrf.mxu2 }
 0x11a   : > { %942 = vmatpush.bf16.msrb.mxu1 %v903_v14  ;;  %v827_v35 = vpop.f32.mrf.mxu3  ;;  %v783_v21 = vadd.f32 %v1525_v41, %v782_v62  ;;  %v816_v62 = vadd.f32 %v1525_v41, %v1604_v53  ;;  %v813_v53 = vadd.f32 %v1525_v41, %v1598_v45 }
 0x11b   : > { %v1616_v7 = vpop.f32.mrf.mxu0  ;;  %v828_v44 = vadd.f32 %v1525_v41, %v827_v35 }
 0x11c   : > { %v875_v0 = vmax.f32 %v783_v21, 0.0  ;;  %v888_v18 = vmax.f32 %v816_v62, 0.0  ;;  %v887_v26 = vmax.f32 %v813_v53, 0.0 }
 0x11d   : > { %v893_v3 = vmax.f32 %v828_v44, 0.0  ;;  %v931_v44 = vunpack.c.h.b16 %v1635_v2  ;;  %v997_v2 = vld [vmem:[%s313_s19 + $0x10] sm:$0xff] }
 0x11e   : > { %943 = vmatpush.bf16.msrb.mxu1 %v902_v19  ;;  %v918_v10 = vpack.c.bf16 %v875_v0, %v874_v61  ;;  %v889_v19 = vmax.f32 %v818_v48, 0.0 }
 0x121   : > { %v785_v28 = vpop.f32.mrf.mxu2 }
 0x122   : > { %944 = vmatpush.bf16.msrb.mxu1 %v901_v27  ;;  %v786_v32 = vadd.f32 %v1525_v41, %v785_v28 }
 0x123   : > { %v1620_v30 = vpop.f32.mrf.mxu0 }
 0x124   : > { %v876_v38 = vmax.f32 %v786_v32, 0.0  ;;  %v713_v37 = vadd.f32 %v1525_v41, %v1620_v30 }
 0x126   : > { %945 = vmatpush.bf16.msrb.mxu1 %v900_v47  ;;  %v895_v47 = vld [vmem:[%s1692_s3 + $0x8] sm:$0xff] }
 0x129   : > { %v787_v34 = vpop.f32.mrf.mxu2 }
 0x12a   : > { %v788_v39 = vadd.f32 %v1525_v41, %v787_v34  ;;  %946 = vmatpush.bf16.msrb.mxu1 %v1582_v13  ;;  %v892_v13 = vmax.f32 %v826_v42, 0.0 }
 0x12b   : > { %v715_v43 = vpop.f32.mrf.mxu0 }
 0x12c   : > { %v877_v49 = vmax.f32 %v788_v39, 0.0  ;;  %v927_v11 = vpack.c.bf16 %v893_v3, %v892_v13  ;;  %v716_v32 = vadd.f32 %v1525_v41, %v715_v43  ;;  %v847_v43 = vmax.f32 %v713_v37, 0.0  ;;  %v996_v13 = vld [vmem:[%s313_s19 + $0x8] sm:$0xff]  ;;  %v998_v3 = vld [vmem:[%s313_s19 + $0x18] sm:$0xff] }
 0x12d   : > { %v1004_v4 = vpack.c.bf16 %v998_v3, %v996_v13 }
 0x12e   : > { %947 = vmatpush.bf16.msrb.mxu1 %v1563_v36  ;;  %v919_v63 = vpack.c.bf16 %v877_v49, %v876_v38  ;;  %v773_v36 = vadd.f32 %v1525_v41, %v1606_v54  ;;  %v917_v54 = vpack.c.bf16 %v873_v9, %v872_v8  ;;  %v848_v39 = vmax.f32 %v716_v32, 0.0 }
 0x12f   : > { %v933_v49 = vunpack.c.h.b16 %v895_v47 }
 0x130   : > { %968 = vmatpush.bf16.msrb.mxu3 %v919_v63  ;;  %v871_v17 = vmax.f32 %v773_v36, 0.0  ;;  %v995_v63 = vld [vmem:[%s313_s19] sm:$0xff] }
 0x132   : > { %948 = vmatpush.bf16.msrb.mxu1 %v1549_v12  ;;  %v811_v12 = vadd.f32 %v1525_v41, %v1594_v33  ;;  %v916_v56 = vpack.c.bf16 %v871_v17, %v870_v16 }
 0x133   : > { %v717_v14 = vpop.f32.mrf.mxu0 }
 0x134   : > { %969 = vmatpush.bf16.msrb.mxu3 %v918_v10  ;;  %v886_v23 = vmax.f32 %v811_v12, 0.0  ;;  %v718_v45 = vadd.f32 %v1525_v41, %v717_v14 }
 0x136   : > { %949 = vmatpush.bf16.msrb.mxu1 %v1535_v52  ;;  %v925_v52 = vpack.c.bf16 %v889_v19, %v888_v18  ;;  %v924_v27 = vpack.c.bf16 %v887_v26, %v886_v23  ;;  %v849_v21 = vmax.f32 %v718_v45, 0.0 }
 0x138   : > { %970 = vmatpush.bf16.msrb.mxu3 %v917_v54 }
 0x139   : > { %950 = vmatmul.bf16.vlgmr.msrb.gmra.mxu1 %v934_v15  ;;  %v1010_v15 = vperm.slane %v1007_v60, 1 }
 0x13a   : > { %981 = vmatpush.bf16.msra.mxu1 %v927_v11 }
 0x13b   : > { %v720_v22 = vpop.f32.mrf.mxu0 }
 0x13c   : > { %971 = vmatpush.bf16.msrb.mxu3 %v916_v56  ;;  %v721_v33 = vadd.f32 %v1525_v41, %v720_v22 }
 0x13e   : > { %982 = vmatpush.bf16.msra.mxu1 %v926_v20  ;;  %v850_v35 = vmax.f32 %v721_v33, 0.0 }
 0x140   : > { %972 = vmatpush.bf16.msrb.mxu3 %v1600_v46  ;;  %v932_v46 = vunpack.c.l.b16 %v895_v47 }
 0x142   : > { %983 = vmatpush.bf16.msra.mxu1 %v925_v52  ;;  %v936_v42 = vpack.c.b16 %v932_v46, %v932_v46 }
 0x143   : > { %v722_v28 = vpop.f32.mrf.mxu0 }
 0x144   : > { %v723_v29 = vadd.f32 %v1525_v41, %v722_v28  ;;  %973 = vmatpush.bf16.msrb.mxu3 %v1590_v40  ;;  %v711_v40 = vadd.f32 %v1525_v41, %v1616_v7  ;;  %v935_v41 = vpack.c.b16 %v931_v44, %v931_v44  ;;  %v937_v7 = vpack.c.b16 %v933_v49, %v933_v49 }
 0x146   : > { %984 = vmatpush.bf16.msra.mxu1 %v924_v27  ;;  %v851_v34 = vmax.f32 %v723_v29, 0.0  ;;  %v846_v30 = vmax.f32 %v711_v40, 0.0 }
 0x148   : > { %974 = vmatpush.bf16.msrb.mxu3 %v1567_v50  ;;  %v906_v38 = vpack.c.bf16 %v851_v34, %v850_v35  ;;  %v904_v50 = vpack.c.bf16 %v847_v43, %v846_v30 }
 0x14a   : > { %985 = vmatpush.bf16.msra.mxu1 %v1592_v31  ;;  %960 = vmatpush.bf16.msrb.mxu2 %v906_v38  ;;  %v905_v31 = vpack.c.bf16 %v849_v21, %v848_v39 }
 0x14c   : > { %975 = vmatpush.bf16.msrb.mxu3 %v1555_v24 }
 0x14e   : > { %986 = vmatpush.bf16.msra.mxu1 %v1569_v51  ;;  %961 = vmatpush.bf16.msrb.mxu2 %v905_v31  ;;  %v999_v51 = vld [vmem:[%s313_s19 + $0x20] sm:$0xff] }
 0x14f   : > { %976 = vmatmul.bf16.vlgmr.msrb.gmra.mxu3 %v936_v42  ;;  %v1005_v61 = vpack.c.bf16 %v1001_v55, %v999_v51 }
 0x152   : > { %987 = vmatpush.bf16.msra.mxu1 %v1557_v25  ;;  %962 = vmatpush.bf16.msrb.mxu2 %v904_v50  ;;  %v1002_v25 = vld [vmem:[%s313_s19 + $0x38] sm:$0xff] }
 0x153   : > { %v1006_v0 = vpack.c.bf16 %v1002_v25, %v1000_v58 }
 0x155   : > { %963 = vmatmul.bf16.vlgmr.msrb.gmra.mxu2 %v935_v41  ;;  %1036 = vmatpush.bf16.msra.mxu3 %v1006_v0 }
 0x156   : > { %988 = vmatpush.bf16.msra.mxu1 %v1543_v1  ;;  %1023 = vmatpush.bf16.msra.mxu2 %v1005_v61  ;;  %v1003_v1 = vpack.c.bf16 %v997_v2, %v995_v63 }
 0x159   : > { %989 = vmatmul.bf16.vlgmr.msra.gmra.mxu1 %v937_v7  ;;  %1037 = vmatpush.bf16.msra.mxu3 %v1004_v4 }
 0x15a   : > { %1024 = vmatpush.bf16.msra.mxu2 %v1003_v1 }
 0x1b6   : > { %v951_v24 = vpop.f32.mrf.mxu1 }
 0x1be   : > { %v953_v57 = vpop.f32.mrf.mxu1 }
 0x1d2   : > { %v977_v59 = vpop.f32.mrf.mxu3 }
 0x1d6   : > { %v990_v6 = vpop.f32.mrf.mxu1 }
 0x1d8   : > { %v964_v36 = vpop.f32.mrf.mxu2 }
 0x1d9   : > { %v965_v8 = vadd.f32 %v964_v36, %v951_v24 }
 0x1da   : > { %v979_v9 = vpop.f32.mrf.mxu3 }
 0x1db   : > { %v978_v10 = vadd.f32 %v977_v59, %v965_v8 }
 0x1dd   : > { %v991_v14 = vadd.f32 %v990_v6, %v978_v10 }
 0x1de   : > { %v992_v11 = vpop.f32.mrf.mxu1 }
 0x1df   : > { %v994_v62 = vpack.c.bf16 %v991_v14, %v991_v14 }
 0x1e0   : > { %v966_v48 = vpop.f32.mrf.mxu2 }
 0x1e1   : > { %1333 = vmatmul.msk.bf16.vlgmr.msra.gmra.mxu2 %vm1013_vm2, %v994_v62  ;;  %1334 = vmatmul.msk.bf16.vlgmr.msra.gmra.mxu3 %vm1013_vm2, %v994_v62 }
 0x264   : > { %v1026_v16 = vpop.f32.mrf.mxu2  ;;  %v1039_v17 = vpop.f32.mrf.mxu3 }
 0x265   : > { %v1027_v54 = vadd.f32 %v1026_v16, %v1009_v5  ;;  %v1040_v12 = vadd.f32 %v1039_v17, %v1010_v15 }
 0x267   : > { %v1043_v53 = vmul.f32 %v1027_v54, %v1027_v54  ;;  %1059 = vst [vmem:[%s322_s29 + $0x8] sm:$0xff] %v1040_v12 }
 0x269   : > { %1044 = vadd.xlane.f32.xlu0 %v1043_v53 }
 0x26c   : > { %v1028_v18 = vpop.f32.mrf.mxu2  ;;  %v1041_v19 = vpop.f32.mrf.mxu3 }
 0x2dc   : > { %v1045_v20 = vpop.xlane.xlu0 %1044 }
 0x2dd   : > { %v1046_v56 = vmax.f32 %v1045_v20, 1e-24 }
 0x2df   : > { %1391 = vrsqrt.f32 %v1046_v56  ;;  %vm1053_vm4 = vweird.f32 %v1046_v56 }
 0x2e5   : > { %v1392_v22 = vpop.eup %1391 }
 0x2e6   : > { %v1048_v23 = vmul.f32 %v1392_v22, %v1046_v56  ;;  %vm1054_vm3 = vweird.f32 %v1392_v22 }
 0x2e7   : > { %vm1055_vm5 = vmor %vm1053_vm4, %vm1054_vm3 }
 0x2e8   : > { %v1049_v26 = vmul.f32 %v1392_v22, %v1048_v23 }
 0x2ea   : > { %v1050_v52 = vmul.f32 0.5, %v1049_v26 }
 0x2ec   : > { %v1051_v27 = vsub.f32 1.5, %v1050_v52 }
 0x2ee   : > { %v1052_v33 = vmul.f32 %v1392_v22, %v1051_v27 }
 0x2f0   : > { %v1056_v28 = vsel %vm1055_vm5, %v1392_v22, %v1052_v33 }
 0x2f1   : > { %v1057_v45 = vmul.f32 %v1056_v28, %v1027_v54 }
 0x2f3   : > { %1058 = vst [vmem:[%s322_s29] sm:$0xff] %v1057_v45 }
 0x2f4 PF: > { %s16_s21 = sadd.s32 1, %s1399_s21  }
 0x2f5   : > { %p13_p4 = scmp.ge.s32.totalorder %s16_s21, 4  }
 0x2f7   :  { %15 = sbr.rel (!%p13_p4) target bundleno = 1 (0x1), region = 86 }

// kernel: moco_forward.5
= control target key start
LH: loop header
LB: loop body
LE: loop exit
PB: predicated region body
PF: predicated region fallthrough
CT: control target
= control target key end

     0   :  { %s2036_s0 = inlined_call_operand.<no memory space> [shape: s32[1], index: 0, kind: input, shape index: {}]   ;;  %s2037_s1 = inlined_call_operand.vmem [shape: s32[2], index: 1, kind: input, shape index: {}]   ;;  %s2038_s2 = inlined_call_operand.vmem [shape: s32[8,1], index: 2, kind: input, shape index: {}]   ;;  %s2039_s3 = inlined_call_operand.vmem [shape: bf16[8,128], index: 3, kind: input, shape index: {}]   ;;  %s2040_s4 = inlined_call_operand.vmem [shape: bf16[128,8], index: 4, kind: input, shape index: {}]   ;;  %s2041_s5 = inlined_call_operand.vmem [shape: bf16[128,512], index: 5, kind: input, shape index: {}, may-alias: {5,9}]   ;;  %s2042_s6 = inlined_call_operand.vmem [shape: s32[1,512], index: 6, kind: input, shape index: {}, may-alias: {6,10}]   ;;  %s2043_s7 = inlined_call_operand.vmem [shape: f32[8,512], index: 7, kind: output, shape index: {0}]   ;;  %s2044_s8 = inlined_call_operand.vmem [shape: f32[8,512], index: 8, kind: output, shape index: {1}]   ;;  %s2045_s9 = inlined_call_operand.vmem [shape: bf16[128,512], index: 9, kind: output, shape index: {2}, may-alias: {5,9}]   ;;  %s2046_s10 = inlined_call_operand.vmem [shape: s32[1,512], index: 10, kind: output, shape index: {3}, may-alias: {6,10}]  }
   0x1   :  { %16 = sst [smem:[#allocation2]] %s2036_s0 }
   0x2   :  { %17 = vsyncpa [#allocation4], 0  ;;  %s1584_s15 = smov 0   ;;  %s1586_s16 = smov 0  }
   0x3   :  { %s1588_s17 = smov 0  }
   0x4 LB: > { %s1600_s0 = sadd.s32 4294967295, %s1519_s17   ;;  %s1603_s18 = sadd.s32 1, %s1519_s17   ;;  %s1519_s17 = sphi %s1588_s17, %s2060_s17   ;;  %s1515_s16 = sphi %s1586_s16, %s2059_s16   ;;  %s1511_s15 = sphi %s1584_s15, %s2058_s15  }
   0x5   : > { %s132_s19 = ssub.s32 %s1519_s17, %s1603_s18  ;;  %s135_s20 = sadd.s32 1, %s1515_s16 }
   0x6   : > { %p133_p0 = scmp.eq.s32.totalorder %s132_s19, 0  ;;  %p142_p1 = scmp.ne.s32.totalorder %s1515_s16, %s1511_s15 }
   0x7   : > { %p143_p2 = scmp.eq.s32.totalorder %s1519_s17, 0  ;;  %p250_p3 = scmp.eq.s32.totalorder %s1600_s0, 1 }
   0x8   : > { %s1613_s21 = scalar_select %p133_p0, %s1515_s16, %s135_s20  }
   0x9   : > { %p1615_p4 = por %p143_p2, %p142_p1  ;;  %p1619_p5 = por %p250_p3, %p142_p1 }
   0xa   : > { %p1328_p6 = scmp.ge.s32.totalorder %s1519_s17, 1  ;;  %p289_p7 = scmp.lt.s32.totalorder %s1519_s17, 3 }
   0xb   : > { %p1441_p8 = scmp.eq.s32.totalorder %s1600_s0, 0  ;;  %s304_s27 = sshll.u32 %s2037_s1, 4  ;;  %s305_s27 = int_to_ptr.vmem [resolvable:$true] %s304_s27 }
   0xc   : > { %p1626_p9 = pnand %p1328_p6, %p289_p7  ;;  %s1521_s28 = smov [#allocation3]  }
   0xd   : > { %p1330_p12 = scmp.ge.s32.totalorder %s1519_s17, 2 }
   0xe   : > { %p1437_p10 = pneg %p1626_p9 }
   0xf   : > { %320 = sbr.rel (%p1330_p12) target bundleno = 40 (0x28), region = 36 }
  0x10   : > { %p1438_p11 = pnand %p1441_p8, %p1437_p10 }
  0x12   : > { %1440 = dma.vmem_to_smem (!%p1438_p11), %s305_s27, 16, %s1521_s28, [#allocation4]  }
  0x14   : > { %323 = sbr.rel (!%p1615_p4) target bundleno = 40 (0x28), region = 40  ;;  %s325_s29 = sand.u32 (%p1615_p4), 1, %s1515_s16  }
  0x15   : > { %s1415_s30 = sshll.u32 (%p1615_p4), %s1519_s17, 3  ;;  %s1331_s11 = sshll.u32 (%p1615_p4), %s325_s29, 7 }
  0x16   : > { %s1645_s14 = scalar_lea.vmem (%p1615_p4), %s2041_s5, %s1415_s30  ;;  %s327_s17 = scalar_lea.vmem (%p1615_p4), [#allocation5], %s1331_s11 }
  0x17   : > { %v389_v0 = vld [vmem:[%s1645_s14] sm:$0xff] (%p1615_p4)  ;;  %v391_v1 = vld [vmem:[%s1645_s14 + $0x10] sm:$0xff] (%p1615_p4) }
  0x18   : > { %v393_v2 = vld [vmem:[%s1645_s14 + $0x20] sm:$0xff] (%p1615_p4)  ;;  %390 = vst [vmem:[%s327_s17] sm:$0xff] (%p1615_p4), %v389_v0  ;;  %v395_v3 = vld [vmem:[%s1645_s14 + $0x30] sm:$0xff] (%p1615_p4) }
  0x19   : > { %392 = vst [vmem:[%s327_s17 + $0x8] sm:$0xff] %v391_v1  ;;  %v397_v4 = vld [vmem:[%s1645_s14 + $0x40] sm:$0xff]  ;;  %v399_v5 = vld [vmem:[%s1645_s14 + $0x50] sm:$0xff] }
  0x1a   : > { %394 = vst [vmem:[%s327_s17 + $0x10] sm:$0xff] %v393_v2  ;;  %v401_v6 = vld [vmem:[%s1645_s14 + $0x60] sm:$0xff]  ;;  %v403_v7 = vld [vmem:[%s1645_s14 + $0x70] sm:$0xff] }
  0x1b   : > { %396 = vst [vmem:[%s327_s17 + $0x18] sm:$0xff] %v395_v3  ;;  %v405_v8 = vld [vmem:[%s1645_s14 + $0x80] sm:$0xff]  ;;  %v407_v9 = vld [vmem:[%s1645_s14 + $0x90] sm:$0xff] }
  0x1c   : > { %398 = vst [vmem:[%s327_s17 + $0x20] sm:$0xff] %v397_v4  ;;  %v409_v10 = vld [vmem:[%s1645_s14 + $0xa0] sm:$0xff]  ;;  %v411_v11 = vld [vmem:[%s1645_s14 + $0xb0] sm:$0xff] }
  0x1d   : > { %400 = vst [vmem:[%s327_s17 + $0x28] sm:$0xff] %v399_v5  ;;  %v413_v12 = vld [vmem:[%s1645_s14 + $0xc0] sm:$0xff]  ;;  %v415_v13 = vld [vmem:[%s1645_s14 + $0xd0] sm:$0xff] }
  0x1e   : > { %402 = vst [vmem:[%s327_s17 + $0x30] sm:$0xff] %v401_v6  ;;  %v417_v14 = vld [vmem:[%s1645_s14 + $0xe0] sm:$0xff]  ;;  %v419_v15 = vld [vmem:[%s1645_s14 + $0xf0] sm:$0xff] }
  0x1f   : > { %404 = vst [vmem:[%s327_s17 + $0x38] sm:$0xff] %v403_v7 }
  0x20   : > { %406 = vst [vmem:[%s327_s17 + $0x40] sm:$0xff] %v405_v8 }
  0x21   : > { %408 = vst [vmem:[%s327_s17 + $0x48] sm:$0xff] %v407_v9 }
  0x22   : > { %410 = vst [vmem:[%s327_s17 + $0x50] sm:$0xff] %v409_v10 }
  0x23   : > { %412 = vst [vmem:[%s327_s17 + $0x58] sm:$0xff] %v411_v11 }
  0x24   : > { %414 = vst [vmem:[%s327_s17 + $0x60] sm:$0xff] %v413_v12 }
  0x25   : > { %416 = vst [vmem:[%s327_s17 + $0x68] sm:$0xff] %v415_v13 }
  0x26   : > { %418 = vst [vmem:[%s327_s17 + $0x70] sm:$0xff] %v417_v14 }
  0x27   : > { %420 = vst [vmem:[%s327_s17 + $0x78] sm:$0xff] %v419_v15 }
  0x28 PF: > { %437 = sbr.rel (%p1626_p9) target bundleno = 262 (0x106), region = 82 }
  0x2d   : > { %1506 = dma.done.wait (%p1441_p8), [#allocation4], 16  }
  0x2e   : > { %1508 = vsyncadd (%p1441_p8), [#allocation4], 4294967280  ;;  %s445_s19 = sand.u32 1, %s1511_s15  }
  0x2f   : > { %s1670_s20 = sshll.u32 %s445_s19, 7 }
  0x30   : > { %s1673_s22 = scalar_lea.vmem [#allocation5], %s1670_s20 }
  0x31   : > { %451 = sfence }
  0x32   : > { %v1678_v16 = vld [vmem:[%s2040_s4 + $0xc] sm:$0xf]  ;;  %v1683_v17 = vld [vmem:[%s2040_s4 + $0x4] sm:$0xf]  ;;  %v1522_v19 = vmov 0   ;;  %s1338_s11 = sshll.u32 %s1600_s0, 1 }
  0x33   : > { %v650_v18 = vld [vmem:[%s2038_s2] sm:$0xff]  ;;  %1474 = vset.pattern.permute.xlu2 %v1522_v19  ;;  %1473 = vset.pattern.permute.xlu1 %v1522_v19  ;;  %v1402_v20 = vld [vmem:[%s1673_s22 + $0x70] sm:$0xf]  ;;  %v1431_v21 = vld [vmem:[%s1673_s22 + $0x74] sm:$0xf0]  ;;  %s662_s12 = sld [smem:[#allocation2]] }
  0x34   : > { %1472 = vset.pattern.permute.xlu0 %v1522_v19  ;;  %735 = vperm.xlu2 %1474, %v1678_v16   ;;  %v1430_v22 = vld [vmem:[%s1673_s22 + $0x74] sm:$0xf]  ;;  %v1403_v23 = vor.u32 %v1431_v21, %v1402_v20  ;;  %v1404_v24 = vld [vmem:[%s1673_s22 + $0x78] sm:$0xf0]  ;;  %v1394_v25 = vld [vmem:[%s1673_s22 + $0x60] sm:$0xf] }
  0x35   : > { %717 = vperm.xlu1 %1473, %v1683_v17   ;;  %654 = vperm.xlu0 %1472, %v650_v18   ;;  %v1429_v26 = vld [vmem:[%s1673_s22 + $0x64] sm:$0xf0]  ;;  %v1407_v27 = vor.u32 %v1430_v22, %v1404_v24  ;;  %v1428_v28 = vld [vmem:[%s1673_s22 + $0x64] sm:$0xf]  ;;  %v1396_v29 = vld [vmem:[%s1673_s22 + $0x68] sm:$0xf0]  ;;  %v679_v22 = vlaneseq }
  0x36   : > { %v1701_v30 = vld [vmem:[%s2040_s4 + $0x10] sm:$0xf]  ;;  %621 = vmatpush.bf16.msra.mxu0 %v1403_v23  ;;  %v1706_v31 = vld [vmem:[%s2040_s4 + $0x8] sm:$0xf]  ;;  %v1711_v32 = vld [vmem:[%s2040_s4] sm:$0xf]  ;;  %v1395_v33 = vor.u32 %v1429_v26, %v1394_v25  ;;  %v1399_v34 = vor.u32 %v1428_v28, %v1396_v29 }
  0x37   : > { %634 = vmatpush.bf16.msra.mxu1 %v1407_v27  ;;  %v1386_v35 = vld [vmem:[%s1673_s22 + $0x50] sm:$0xf]  ;;  %v1427_v36 = vld [vmem:[%s1673_s22 + $0x54] sm:$0xf0]  ;;  %v1426_v37 = vld [vmem:[%s1673_s22 + $0x54] sm:$0xf] }
  0x38   : > { %v1388_v38 = vld [vmem:[%s1673_s22 + $0x58] sm:$0xf0]  ;;  %v1387_v39 = vor.u32 %v1427_v36, %v1386_v35  ;;  %v1378_v41 = vld [vmem:[%s1673_s22 + $0x40] sm:$0xf]  ;;  %v1425_v42 = vld [vmem:[%s1673_s22 + $0x44] sm:$0xf0] }
  0x39   : > { %v1391_v40 = vor.u32 %v1426_v37, %v1388_v38  ;;  %v1424_v43 = vld [vmem:[%s1673_s22 + $0x44] sm:$0xf]  ;;  %v1380_v44 = vld [vmem:[%s1673_s22 + $0x48] sm:$0xf0]  ;;  %v1727_v45 = vld [vmem:[%s2040_s4 + $0x1c] sm:$0xf]  ;;  %v1379_v48 = vor.u32 %v1425_v42, %v1378_v41  ;;  %v703_v26 = vstv %s662_s12 }
  0x3a   : > { %622 = vmatpush.bf16.msra.mxu0 %v1395_v33  ;;  %v1732_v46 = vld [vmem:[%s2040_s4 + $0x18] sm:$0xf]  ;;  %v1737_v47 = vld [vmem:[%s2040_s4 + $0x14] sm:$0xf]  ;;  %v1383_v49 = vor.u32 %v1424_v43, %v1380_v44  ;;  %v1370_v50 = vld [vmem:[%s1673_s22 + $0x30] sm:$0xf] }
  0x3b   : > { %635 = vmatpush.bf16.msra.mxu1 %v1399_v34  ;;  %v1423_v51 = vld [vmem:[%s1673_s22 + $0x34] sm:$0xf0]  ;;  %v1422_v52 = vld [vmem:[%s1673_s22 + $0x34] sm:$0xf]  ;;  %v1372_v53 = vld [vmem:[%s1673_s22 + $0x38] sm:$0xf0] }
  0x3c   : > { %744 = vperm.xlu2 %1474, %v1701_v30   ;;  %v1371_v54 = vor.u32 %v1423_v51, %v1370_v50  ;;  %v1375_v55 = vor.u32 %v1422_v52, %v1372_v53  ;;  %v1362_v56 = vld [vmem:[%s1673_s22 + $0x20] sm:$0xf]  ;;  %v1421_v57 = vld [vmem:[%s1673_s22 + $0x24] sm:$0xf0]  ;;  %v1420_v58 = vld [vmem:[%s1673_s22 + $0x24] sm:$0xf] }
  0x3d   : > { %726 = vperm.xlu1 %1473, %v1706_v31   ;;  %708 = vperm.xlu0 %1472, %v1711_v32   ;;  %v1364_v59 = vld [vmem:[%s1673_s22 + $0x28] sm:$0xf0]  ;;  %v673_v60 = vld [vmem:[%s2040_s4 + $0x28] sm:$0xf]  ;;  %v672_v61 = vld [vmem:[%s2040_s4 + $0x24] sm:$0xf]  ;;  %v1363_v63 = vor.u32 %v1421_v57, %v1362_v56 }
  0x3e   : > { %623 = vmatpush.bf16.msra.mxu0 %v1387_v39  ;;  %v671_v62 = vld [vmem:[%s2040_s4 + $0x20] sm:$0xf]  ;;  %v1367_v0 = vor.u32 %v1420_v58, %v1364_v59  ;;  %v1354_v1 = vld [vmem:[%s1673_s22 + $0x10] sm:$0xf]  ;;  %v1419_v2 = vld [vmem:[%s1673_s22 + $0x14] sm:$0xf0] }
  0x3f   : > { %636 = vmatpush.bf16.msra.mxu1 %v1391_v40  ;;  %v1418_v3 = vld [vmem:[%s1673_s22 + $0x14] sm:$0xf]  ;;  %v1356_v4 = vld [vmem:[%s1673_s22 + $0x18] sm:$0xf0]  ;;  %v1355_v5 = vor.u32 %v1419_v2, %v1354_v1  ;;  %v1346_v7 = vld [vmem:[%s1673_s22] sm:$0xf] }
  0x40   : > { %v1359_v6 = vor.u32 %v1418_v3, %v1356_v4  ;;  %v1417_v8 = vld [vmem:[%s1673_s22 + $0x4] sm:$0xf0]  ;;  %v1416_v9 = vld [vmem:[%s1673_s22 + $0x4] sm:$0xf]  ;;  %v1348_v10 = vld [vmem:[%s1673_s22 + $0x8] sm:$0xf0] }
  0x41   : > { %v676_v11 = vld [vmem:[%s2040_s4 + $0x34] sm:$0xf]  ;;  %v675_v12 = vld [vmem:[%s2040_s4 + $0x30] sm:$0xf]  ;;  %v674_v13 = vld [vmem:[%s2040_s4 + $0x2c] sm:$0xf]  ;;  %v1347_v14 = vor.u32 %v1417_v8, %v1346_v7  ;;  %v1351_v15 = vor.u32 %v1416_v9, %v1348_v10 }
  0x42   : > { %624 = vmatpush.bf16.msra.mxu0 %v1379_v48  ;;  %v524_v18 = vld [vmem:[%s2039_s3] sm:$0xf]  ;;  %v678_v19 = vld [vmem:[%s2040_s4 + $0x3c] sm:$0xf]  ;;  %v677_v20 = vld [vmem:[%s2040_s4 + $0x38] sm:$0xf] }
  0x43   : > { %637 = vmatpush.bf16.msra.mxu1 %v1383_v49  ;;  %v1523_v21 = vmov 1   ;;  %p502_p13 = scmp.lt.s32.totalorder %s1338_s11, 3  ;;  %s1408_s13 = sshll.u32 %s1600_s0, 8  ;;  %vm1043_vm4 = vcmask 1040384   ;;  %vm1047_vm5 = vcmp.lt.s32.totalorder %v679_v22, 256  ;;  %v1524_v50 = vmov -1.0  }
  0x44   : > { %771 = vperm.xlu2 %1474, %v1727_v45   ;;  %s867_s14 = sld [smem:[#allocation3]]  ;;  %v683_v23 = vstv %s1408_s13  ;;  %s873_s19 = sadd.s32 1, %s662_s12  ;;  %v1525_v56 = vmov 839922192   ;;  %v688_v34 = vld [vmem:[%s1673_s22 + $0x10] sm:$0xff] }
  0x45   : > { %762 = vperm.xlu1 %1473, %v1732_v46   ;;  %753 = vperm.xlu0 %1472, %v1737_v47   ;;  %s1409_s17 = sld [smem:[#allocation3 + $0x1]]  ;;  %s2062_s11 = smov (!%p502_p13, %s1338_s11), 3  ;;  %v874_v29 = vstv %s873_s19  ;;  %v712_v57 = vunpack.c.l.s4 %v1525_v56 }
  0x46   : > { %625 = vmatpush.bf16.msra.mxu0 %v1371_v54  ;;  %s504_s24 = scalar_lea.vmem %s2042_s6, %s2062_s11  ;;  %s522_s28 = scalar_lea.vmem %s2046_s10, %s2062_s11 }
  0x47   : > { %638 = vmatpush.bf16.msra.mxu1 %v1375_v55  ;;  %v702_v27 = vld [vmem:[%s504_s24] sm:$0x3]  ;;  %s1340_s29 = sshll.u32 %s2062_s11, 3  ;;  %v1835_v58 = vunpack.c.0.s8 %v712_v57 }
  0x48   : > { %v870_v33 = vperm.slane %v702_v27, 1  ;;  %v649_v41 = vld [vmem:[%s504_s24] sm:$0x3]  ;;  %s516_s13 = scalar_lea.vmem %s2044_s8, %s1340_s29  ;;  %s510_s19 = scalar_lea.vmem %s2043_s7, %s1340_s29 }
  0x49   : > { %v690_v57 = vld [vmem:[%s1673_s22 + $0x20] sm:$0xff] }
  0x4a   : > { %626 = vmatpush.bf16.msra.mxu0 %v1363_v63  ;;  %v868_v28 = vstv %s867_s14  ;;  %s1861_s14 = scalar_lea.vmem [#allocation6], %s1670_s20 }
  0x4b   : > { %639 = vmatpush.bf16.msra.mxu1 %v1367_v0 }
  0x4c   : > { %798 = vperm.xlu2 %1474, %v673_v60  }
  0x4d   : > { %789 = vperm.xlu1 %1473, %v672_v61   ;;  %780 = vperm.xlu0 %1472, %v671_v62  }
  0x4e   : > { %627 = vmatpush.bf16.msra.mxu0 %v1355_v5 }
  0x4f   : > { %640 = vmatpush.bf16.msra.mxu1 %v1359_v6  ;;  %v689_v6 = vld [vmem:[%s1673_s22 + $0x18] sm:$0xff] }
  0x52   : > { %628 = vmatpush.bf16.msra.mxu0 %v1347_v14  ;;  %v691_v14 = vld [vmem:[%s1673_s22 + $0x28] sm:$0xff] }
  0x53   : > { %641 = vmatpush.bf16.msra.mxu1 %v1351_v15 }
  0x54   : > { %825 = vperm.xlu2 %1474, %v676_v11  }
  0x55   : > { %816 = vperm.xlu1 %1473, %v675_v12   ;;  %807 = vperm.xlu0 %1472, %v674_v13  }
  0x56   : > { %629 = vmatmul.bf16.vlgmr.msra.gmra.mxu0 %v524_v18  ;;  %642 = vmatmul.bf16.vlgmr.msra.gmra.mxu1 %v524_v18 }
  0x5c   : > { %1475 = vset.pattern.permute.xlu2 %v1523_v21 }
  0x5d   : > { %843 = vperm.xlu1 %1473, %v678_v19   ;;  %834 = vperm.xlu0 %1472, %v677_v20  }
  0x5e   : > { %878 = vperm.xlu2 %1475, %v1711_v32   ;;  %v1023_v32 = vstv %s1409_s17 }
  0x65   : > { %1477 = vset.pattern.permute.xlu1 %v1523_v21  ;;  %1476 = vset.pattern.permute.xlu0 %v1523_v21 }
  0x66   : > { %902 = vperm.xlu2 %1475, %v1678_v16   ;;  %894 = vperm.xlu1 %1477, %v1706_v31   ;;  %v680_v16 = vand.u32 127, %v679_v22 }
  0x67   : > { %886 = vperm.xlu0 %1476, %v1683_v17  }
  0x68   : > { %v681_v17 = vadd.s32 128, %v680_v16  ;;  %v684_v24 = vadd.s32 %v683_v23, %v680_v16 }
  0x6a   : > { %v685_v25 = vadd.s32 %v683_v23, %v681_v17  ;;  %vm1801_vm0 = vcmp.eq.s32.totalorder %v684_v24, %v703_v26  ;;  %vm875_vm2 = vcmp.eq.s32.totalorder %v684_v24, %v874_v29  ;;  %v694_v17 = vld [vmem:[%s1673_s22 + $0x40] sm:$0xff] }
  0x6c   : > { %vm1805_vm1 = vcmp.eq.s32.totalorder %v685_v25, %v703_v26  ;;  %vm876_vm3 = vcmp.eq.s32.totalorder %v685_v25, %v874_v29 }
  0x6d   : > { %v872_v37 = vsel %vm1805_vm1, %v868_v28, %v870_v33  ;;  %vm1843_vm8 = vmpackc.low %vm876_vm3, %vm875_vm2 }
  0x6e   : > { %918 = vperm.xlu2 %1475, %v1737_v47   ;;  %910 = vperm.xlu1 %1477, %v1701_v30   ;;  %v869_v30 = vperm.slane %v702_v27, 0  ;;  %v1025_v39 = vsel %vm876_vm3, %v1023_v32, %v872_v37  ;;  %vm1851_vm9 = vmpackc.low %vm1805_vm1, %vm1801_vm0 }
  0x6f   : > { %926 = vperm.xlu0 %1476, %v1732_v46   ;;  %v1042_v40 = vrot.slane %v1025_v39, 7  ;;  %v652_v46 = vperm.slane %v649_v41, 1 }
  0x70   : > { %v871_v35 = vsel %vm1801_vm0, %v868_v28, %v869_v30 }
  0x71   : > { %v1024_v38 = vsel %vm875_vm2, %v1023_v32, %v871_v35  ;;  %v697_v35 = vld [vmem:[%s1673_s22 + $0x58] sm:$0xff] }
  0x72   : > { %v1044_v42 = vsel %vm1043_vm4, %v1024_v38, %v1042_v40 }
  0x73   : > { %1049 = vst.msk [vmem:[%s522_s28] sm:$0x3] %vm1047_vm5, %v1044_v42 }
  0x76   : > { %942 = vperm.xlu2 %1475, %v671_v62   ;;  %934 = vperm.xlu1 %1477, %v1727_v45   ;;  %v651_v45 = vperm.slane %v649_v41, 0 }
  0x77   : > { %950 = vperm.xlu0 %1476, %v672_v61  }
  0x7e   : > { %966 = vperm.xlu2 %1475, %v674_v13   ;;  %958 = vperm.xlu1 %1477, %v673_v60   ;;  %v686_v60 = vld [vmem:[%s1673_s22] sm:$0xff] }
  0x7f   : > { %974 = vperm.xlu0 %1476, %v675_v12  }
  0x86   : > { %990 = vperm.xlu2 %1475, %v677_v20   ;;  %982 = vperm.xlu1 %1477, %v676_v11  }
  0x87   : > { %998 = vperm.xlu0 %1476, %v678_v19  }
  0x8e   : > { %v736_v36 = vpop.permute.xlu2 %735 }
  0x8f   : > { %v741_v5 = vperm.slane %v736_v36, %v1835_v58  ;;  %v687_v36 = vld [vmem:[%s1673_s22 + $0x8] sm:$0xff] }
  0x91   : > { %v854_v11 = vsel %vm1851_vm9, %v741_v5, %v689_v6 }
  0x96   : > { %v1819_v43 = vpop.permute.xlu2 %744 }
  0x9e   : > { %v1821_v44 = vpop.permute.xlu2 %771 }
  0xa6   : > { %v1824_v47 = vpop.permute.xlu2 %798 }
  0xa7   : > { %v1826_v48 = vpop.permute.xlu1 %717  ;;  %v655_v49 = vpop.permute.xlu0 %654 }
  0xa8   : > { %vm656_vm6 = vcmp.eq.s32.totalorder %v651_v45, %v655_v49  ;;  %vm657_vm7 = vcmp.eq.s32.totalorder %v652_v46, %v655_v49  ;;  %v723_v33 = vperm.slane %v1826_v48, %v1835_v58 }
  0xa9   : > { %v658_v51 = vsel %vm656_vm6, 1.0, %v1524_v50  ;;  %v659_v52 = vsel %vm657_vm7, 1.0, %v1524_v50 }
  0xaa   : > { %660 = vst [vmem:[%s516_s13] sm:$0xff] %v658_v51  ;;  %v852_v48 = vsel %vm1851_vm9, %v723_v33, %v687_v36 }
  0xab   : > { %661 = vst [vmem:[%s516_s13 + $0x8] sm:$0xff] %v659_v52  ;;  %v750_v52 = vperm.slane %v1819_v43, %v1835_v58 }
  0xad   : > { %v855_v5 = vsel %vm1851_vm9, %v750_v52, %v690_v57 }
  0xae   : > { %v1833_v53 = vpop.permute.xlu2 %825 }
  0xaf   : > { %v727_v54 = vpop.permute.xlu1 %726  ;;  %v709_v55 = vpop.permute.xlu0 %708 }
  0xb0   : > { %v714_v59 = vperm.slane %v709_v55, %v1835_v58  ;;  %v732_v29 = vperm.slane %v727_v54, %v1835_v58 }
  0xb2   : > { %v851_v3 = vsel %vm1851_vm9, %v714_v59, %v686_v60  ;;  %v853_v42 = vsel %vm1851_vm9, %v732_v29, %v688_v34  ;;  %v700_v60 = vld [vmem:[%s1673_s22 + $0x70] sm:$0xff]  ;;  %v831_v34 = vperm.slane %v1833_v53, %v1835_v58 }
  0xb7   : > { %v1839_v61 = vpop.permute.xlu1 %762  ;;  %v754_v62 = vpop.permute.xlu0 %753 }
  0xb8   : > { %v879_v0 = vpop.permute.xlu2 %878  ;;  %v759_v13 = vperm.slane %v754_v62, %v1835_v58  ;;  %v768_v59 = vperm.slane %v1839_v61, %v1835_v58  ;;  %v692_v62 = vld [vmem:[%s1673_s22 + $0x30] sm:$0xff] }
  0xb9   : > { %v884_v2 = vperm.slane %v879_v0, %v1835_v58 }
  0xba   : > { %v856_v21 = vsel %vm1851_vm9, %v759_v13, %v691_v14  ;;  %v693_v13 = vld [vmem:[%s1673_s22 + $0x38] sm:$0xff] }
  0xbb   : > { %v1006_v4 = vsel %vm1843_vm8, %v884_v2, %v851_v3 }
  0xbc   : > { %1026 = vst [vmem:[%s1861_s14] sm:$0xff] %v1006_v4 }
  0xbf   : > { %v1866_v7 = vpop.permute.xlu1 %789  ;;  %v781_v8 = vpop.permute.xlu0 %780 }
  0xc0   : > { %v903_v9 = vpop.permute.xlu2 %902  ;;  %v786_v16 = vperm.slane %v781_v8, %v1835_v58  ;;  %v857_v8 = vsel %vm1851_vm9, %v768_v59, %v692_v62  ;;  %v795_v14 = vperm.slane %v1866_v7, %v1835_v58 }
  0xc1   : > { %v908_v10 = vperm.slane %v903_v9, %v1835_v58 }
  0xc2   : > { %v859_v27 = vsel %vm1851_vm9, %v786_v16, %v694_v17 }
  0xc3   : > { %v1009_v12 = vsel %vm1843_vm8, %v908_v10, %v854_v11 }
  0xc4   : > { %1029 = vst [vmem:[%s1861_s14 + $0x18] sm:$0xff] %v1009_v12  ;;  %v777_v12 = vperm.slane %v1821_v44, %v1835_v58 }
  0xc7   : > { %v1876_v15 = vpop.permute.xlu1 %816  ;;  %v808_v18 = vpop.permute.xlu0 %807 }
  0xc8   : > { %v919_v19 = vpop.permute.xlu2 %918  ;;  %v813_v30 = vperm.slane %v808_v18, %v1835_v58  ;;  %v695_v18 = vld [vmem:[%s1673_s22 + $0x48] sm:$0xff] }
  0xc9   : > { %v924_v20 = vperm.slane %v919_v19, %v1835_v58  ;;  %v860_v44 = vsel %vm1851_vm9, %v795_v14, %v695_v18 }
  0xca   : > { %v862_v45 = vsel %vm1851_vm9, %v813_v30, %v697_v35  ;;  %v699_v35 = vld [vmem:[%s1673_s22 + $0x68] sm:$0xff] }
  0xcb   : > { %v1011_v22 = vsel %vm1843_vm8, %v924_v20, %v856_v21 }
  0xcc   : > { %1031 = vst [vmem:[%s1861_s14 + $0x28] sm:$0xff] %v1011_v22  ;;  %v858_v22 = vsel %vm1851_vm9, %v777_v12, %v693_v13 }
  0xcf   : > { %v1886_v23 = vpop.permute.xlu1 %843  ;;  %v835_v24 = vpop.permute.xlu0 %834 }
  0xd0   : > { %v943_v25 = vpop.permute.xlu2 %942  ;;  %v840_v54 = vperm.slane %v835_v24, %v1835_v58  ;;  %v804_v24 = vperm.slane %v1824_v47, %v1835_v58  ;;  %v849_v36 = vperm.slane %v1886_v23, %v1835_v58 }
  0xd1   : > { %v948_v26 = vperm.slane %v943_v25, %v1835_v58  ;;  %v696_v25 = vld [vmem:[%s1673_s22 + $0x50] sm:$0xff] }
  0xd2   : > { %v865_v6 = vsel %vm1851_vm9, %v840_v54, %v700_v60 }
  0xd3   : > { %v1014_v28 = vsel %vm1843_vm8, %v948_v26, %v859_v27  ;;  %v630_v31 = vpop.f32.mrf.mxu0  ;;  %v643_v32 = vpop.f32.mrf.mxu1  ;;  %v822_v26 = vperm.slane %v1876_v15, %v1835_v58  ;;  %v698_v27 = vld [vmem:[%s1673_s22 + $0x60] sm:$0xff] }
  0xd4   : > { %1034 = vst [vmem:[%s1861_s14 + $0x40] sm:$0xff] %v1014_v28 }
  0xd5   : > { %647 = vst [vmem:[%s510_s19] sm:$0xff] %v630_v31  ;;  %v861_v31 = vsel %vm1851_vm9, %v804_v24, %v696_v25  ;;  %v863_v33 = vsel %vm1851_vm9, %v822_v26, %v698_v27 }
  0xd6   : > { %648 = vst [vmem:[%s510_s19 + $0x8] sm:$0xff] %v643_v32 }
  0xd8   : > { %v967_v37 = vpop.permute.xlu2 %966  ;;  %v895_v38 = vpop.permute.xlu1 %894 }
  0xd9   : > { %v972_v39 = vperm.slane %v967_v37, %v1835_v58  ;;  %v900_v40 = vperm.slane %v895_v38, %v1835_v58  ;;  %v887_v41 = vpop.permute.xlu0 %886  ;;  %v701_v37 = vld [vmem:[%s1673_s22 + $0x78] sm:$0xff]  ;;  %s1432_s22 = sshll.u32 (%p1619_p5), %s1600_s0, 3 }
  0xda   : > { %v892_v46 = vperm.slane %v887_v41, %v1835_v58  ;;  %v864_v41 = vsel %vm1851_vm9, %v831_v34, %v699_v35  ;;  %s1081_s26 = scalar_lea.vmem (%p1619_p5), %s2045_s9, %s1432_s22 }
  0xdb   : > { %v1017_v49 = vsel %vm1843_vm8, %v972_v39, %v862_v45  ;;  %v1008_v50 = vsel %vm1843_vm8, %v900_v40, %v853_v42  ;;  %v632_v55 = vpop.f32.mrf.mxu0  ;;  %v645_v56 = vpop.f32.mrf.mxu1  ;;  %v866_v45 = vsel %vm1851_vm9, %v849_v36, %v701_v37  ;;  %v1156_v52 = vld [vmem:[%s1861_s14 + $0x40] sm:$0xff] (%p1619_p5) }
  0xdc   : > { %1037 = vst [vmem:[%s1861_s14 + $0x58] sm:$0xff] %v1017_v49  ;;  %v1007_v51 = vsel %vm1843_vm8, %v892_v46, %v852_v48  ;;  %v1146_v46 = vld [vmem:[%s1861_s14 + $0x18] sm:$0xff] (%p1619_p5)  ;;  %v1150_v49 = vld [vmem:[%s1861_s14 + $0x28] sm:$0xff] (%p1619_p5) }
  0xdd   : > { %1028 = vst [vmem:[%s1861_s14 + $0x10] sm:$0xff] %v1008_v50 }
  0xde   : > { %1027 = vst [vmem:[%s1861_s14 + $0x8] sm:$0xff] %v1007_v51 }
  0xdf   : > { %1147 = vst [vmem:[%s1081_s26 + $0x30] sm:$0xff] (%p1619_p5), %v1146_v46 }
  0xe0   : > { %v991_v0 = vpop.permute.xlu2 %990  ;;  %v911_v2 = vpop.permute.xlu1 %910  ;;  %1151 = vst [vmem:[%s1081_s26 + $0x50] sm:$0xff] (%p1619_p5), %v1150_v49 }
  0xe1   : > { %v996_v3 = vperm.slane %v991_v0, %v1835_v58  ;;  %v916_v43 = vperm.slane %v911_v2, %v1835_v58  ;;  %v927_v4 = vpop.permute.xlu0 %926  ;;  %1157 = vst [vmem:[%s1081_s26 + $0x80] sm:$0xff] (%p1619_p5), %v1156_v52 }
  0xe2   : > { %v932_v61 = vperm.slane %v927_v4, %v1835_v58 }
  0xe3   : > { %v1020_v9 = vsel %vm1843_vm8, %v996_v3, %v865_v6  ;;  %v1010_v10 = vsel %vm1843_vm8, %v916_v43, %v855_v5  ;;  %v1162_v56 = vld [vmem:[%s1861_s14 + $0x58] sm:$0xff] (%p1619_p5) }
  0xe4   : > { %1040 = vst [vmem:[%s1861_s14 + $0x70] sm:$0xff] %v1020_v9  ;;  %v1012_v11 = vsel %vm1843_vm8, %v932_v61, %v857_v8  ;;  %v1144_v63 = vld [vmem:[%s1861_s14 + $0x10] sm:$0xff] (%p1619_p5) }
  0xe5   : > { %1030 = vst [vmem:[%s1861_s14 + $0x20] sm:$0xff] %v1010_v10  ;;  %v1142_v1 = vld [vmem:[%s1861_s14 + $0x8] sm:$0xff] (%p1619_p5) }
  0xe6   : > { %1032 = vst [vmem:[%s1861_s14 + $0x30] sm:$0xff] %v1012_v11 }
  0xe7   : > { %1143 = vst [vmem:[%s1081_s26 + $0x10] sm:$0xff] (%p1619_p5), %v1142_v1 }
  0xe8   : > { %v935_v19 = vpop.permute.xlu1 %934  ;;  %1145 = vst [vmem:[%s1081_s26 + $0x20] sm:$0xff] (%p1619_p5), %v1144_v63 }
  0xe9   : > { %v940_v20 = vperm.slane %v935_v19, %v1835_v58  ;;  %v951_v21 = vpop.permute.xlu0 %950  ;;  %1163 = vst [vmem:[%s1081_s26 + $0xb0] sm:$0xff] (%p1619_p5), %v1162_v56 }
  0xea   : > { %v956_v16 = vperm.slane %v951_v21, %v1835_v58 }
  0xeb   : > { %v1013_v17 = vsel %vm1843_vm8, %v940_v20, %v858_v22  ;;  %v1168_v60 = vld [vmem:[%s1861_s14 + $0x70] sm:$0xff] (%p1619_p5) }
  0xec   : > { %1033 = vst [vmem:[%s1861_s14 + $0x38] sm:$0xff] %v1013_v17  ;;  %v1015_v7 = vsel %vm1843_vm8, %v956_v16, %v860_v44  ;;  %v1148_v48 = vld [vmem:[%s1861_s14 + $0x20] sm:$0xff] (%p1619_p5) }
  0xed   : > { %1035 = vst [vmem:[%s1861_s14 + $0x48] sm:$0xff] %v1015_v7  ;;  %v1152_v50 = vld [vmem:[%s1861_s14 + $0x30] sm:$0xff] (%p1619_p5) }
  0xee   : > { %1149 = vst [vmem:[%s1081_s26 + $0x40] sm:$0xff] (%p1619_p5), %v1148_v48 }
  0xef   : > { %1153 = vst [vmem:[%s1081_s26 + $0x60] sm:$0xff] (%p1619_p5), %v1152_v50 }
  0xf0   : > { %v959_v28 = vpop.permute.xlu1 %958  ;;  %1169 = vst [vmem:[%s1081_s26 + $0xe0] sm:$0xff] (%p1619_p5), %v1168_v60 }
  0xf1   : > { %v964_v29 = vperm.slane %v959_v28, %v1835_v58  ;;  %v975_v30 = vpop.permute.xlu0 %974 }
  0xf2   : > { %v980_v32 = vperm.slane %v975_v30, %v1835_v58 }
  0xf3   : > { %v1016_v47 = vsel %vm1843_vm8, %v964_v29, %v861_v31  ;;  %v1154_v51 = vld [vmem:[%s1861_s14 + $0x38] sm:$0xff] (%p1619_p5) }
  0xf4   : > { %1036 = vst [vmem:[%s1861_s14 + $0x50] sm:$0xff] %v1016_v47  ;;  %v1018_v15 = vsel %vm1843_vm8, %v980_v32, %v863_v33  ;;  %v1158_v54 = vld [vmem:[%s1861_s14 + $0x48] sm:$0xff] (%p1619_p5) }
  0xf5   : > { %1038 = vst [vmem:[%s1861_s14 + $0x60] sm:$0xff] %v1018_v15 }
  0xf6   : > { %1155 = vst [vmem:[%s1081_s26 + $0x70] sm:$0xff] (%p1619_p5), %v1154_v51 }
  0xf7   : > { %1159 = vst [vmem:[%s1081_s26 + $0x90] sm:$0xff] (%p1619_p5), %v1158_v54 }
  0xf8   : > { %v983_v38 = vpop.permute.xlu1 %982 }
  0xf9   : > { %v988_v39 = vperm.slane %v983_v38, %v1835_v58  ;;  %v999_v40 = vpop.permute.xlu0 %998  ;;  %1078 = sbr.rel (!%p1619_p5) target bundleno = 262 (0x106), region = 102 }
  0xfa   : > { %v1004_v42 = vperm.slane %v999_v40, %v1835_v58  ;;  %v1140_v58 = vld [vmem:[%s1861_s14] sm:$0xff] (%p1619_p5) }
  0xfb   : > { %v1019_v53 = vsel %vm1843_vm8, %v988_v39, %v864_v41  ;;  %1141 = vst [vmem:[%s1081_s26] sm:$0xff] (%p1619_p5), %v1140_v58  ;;  %v1160_v55 = vld [vmem:[%s1861_s14 + $0x50] sm:$0xff] (%p1619_p5) }
  0xfc   : > { %1039 = vst [vmem:[%s1861_s14 + $0x68] sm:$0xff] %v1019_v53  ;;  %v1021_v23 = vsel %vm1843_vm8, %v1004_v42, %v866_v45  ;;  %v1164_v57 = vld [vmem:[%s1861_s14 + $0x60] sm:$0xff] (%p1619_p5) }
  0xfd   : > { %1041 = vst [vmem:[%s1861_s14 + $0x78] sm:$0xff] %v1021_v23 }
  0xfe   : > { %1161 = vst [vmem:[%s1081_s26 + $0xa0] sm:$0xff] %v1160_v55 }
  0xff   : > { %1165 = vst [vmem:[%s1081_s26 + $0xc0] sm:$0xff] %v1164_v57 }
 0x103   : > { %v1166_v59 = vld [vmem:[%s1861_s14 + $0x68] sm:$0xff] }
 0x104   : > { %v1170_v62 = vld [vmem:[%s1861_s14 + $0x78] sm:$0xff]  ;;  %1167 = vst [vmem:[%s1081_s26 + $0xd0] sm:$0xff] %v1166_v59 }
 0x105   : > { %1171 = vst [vmem:[%s1081_s26 + $0xf0] sm:$0xff] %v1170_v62 }
 0x106 PF: > { %p20_p0 = scmp.ge.s32.totalorder %s1603_s18, 4   ;;  %s2058_s15 = smov %s1515_s16 }
 0x107   : > { %s2059_s16 = smov %s1613_s21  ;;  %s2060_s17 = smov %s1603_s18 }
 0x108   :  { %22 = sbr.rel (!%p20_p0) target bundleno = 4 (0x4), region = 203 }
 0x10d   :  { %1214 = vsyncpa [#allocation4], 1 }
 0x10e   :  { %1216 = vsyncpa [#allocation4 + $0x1], 1 }

</bundles_post_ra>
